<compile_context>
chip_gen: v6e
topology: v6e:2x2x1
jax: 0.10.0
libtpu: 0.0.40
codegen_flags: <defaults>
</compile_context>

<pallas_src>
import math

import jax
import jax.numpy as jnp
from jax import lax
from jax.experimental import pallas as pl
from jax.experimental.pallas import tpu as pltpu


def attention_pooler_kernel(
    x_ref,            # (TB*L, D)  compute dtype (rows for this batch tile)
    qp_ref,           # (1, D)     f32, pre-scaled query projection
    wk_ref, bk_ref,   # (D, D) cdt, (1, D) f32
    wv_ref, bv_ref,
    wo_ref, bo_ref,
    w1_ref, b1_ref,
    w2_ref, b2_ref,
    gamma_ref, beta_ref,
    out_ref,          # (TB, D) f32
):
    TB, D = out_ref.shape
    L = x_ref.shape[0] // TB
    cdt = wk_ref.dtype                      # compute dtype for MXU inputs

    x = x_ref[...]                          # (TB*L, D)

    # --- K / V projections: one big (TB*L, D) x (D, D) MXU matmul each -----
    kp = jnp.dot(x, wk_ref[...], preferred_element_type=jnp.float32) + bk_ref[...]
    vp = jnp.dot(x, wv_ref[...], preferred_element_type=jnp.float32) + bv_ref[...]
    kp3 = kp.reshape(TB, L, D)              # f32, tile-aligned reshape
    vp3 = vp.reshape(TB, L, D)

    # --- scores / softmax / context on VPU + XLU (L is far too small for MXU)
    qp = qp_ref[...]                        # (1, D), already scaled by 1/sqrt(D)
    scores = jnp.sum(kp3 * qp, axis=-1)     # (TB, L)  f32
    m = jnp.max(scores, axis=-1, keepdims=True)
    e = jnp.exp(scores - m)
    denom = jnp.sum(e, axis=-1, keepdims=True)
    attn = e * pl.reciprocal(denom, approx=True)        # (TB, L)
    # TODO(synk): MultiheadAttention's dropout=0.1 is identity at eval; not modeled.
    ctx = jnp.sum(attn[:, :, None] * vp3, axis=1)        # (TB, D) f32

    # --- out-proj + MLP: batched (TB, D) x (D, D) MXU matmuls ---------------
    a = jnp.dot(ctx.astype(cdt), wo_ref[...],
                preferred_element_type=jnp.float32) + bo_ref[...]
    h = jnp.dot(a.astype(cdt), w1_ref[...],
                preferred_element_type=jnp.float32) + b1_ref[...]
    h = jnp.maximum(h, 0.0)
    h = jnp.dot(h.astype(cdt), w2_ref[...],
                preferred_element_type=jnp.float32) + b2_ref[...]

    # --- LayerNorm (f32) ----------------------------------------------------
    mean = jnp.mean(h, axis=-1, keepdims=True)
    var = jnp.mean((h - mean) ** 2, axis=-1, keepdims=True)
    hn = (h - mean) * lax.rsqrt(var + 1e-5)
    out = hn * gamma_ref[...] + beta_ref[...]
    # TODO(synk): mlp's Dropout(0.1) is identity at eval; not modeled.

    out_ref[...] = out.astype(out_ref.dtype)


def prepare_params(p, compute_dtype=jnp.float32):
    """One-time packing: pre-transpose weights to (in, out) layout, fold the
    batch-independent query projection and the 1/sqrt(D) scale, and cast the
    matmul weights to `compute_dtype` (bf16 recommended on v6e/v7x)."""
    D = p["wk"].shape[0]
    qp = (p["query"] @ p["wq"].T + p["bq"]) * (1.0 / math.sqrt(D))
    f32 = jnp.float32
    return {
        "qp": qp.astype(f32),                                    # (1, D)
        "wk": p["wk"].T.astype(compute_dtype), "bk": p["bk"].astype(f32),
        "wv": p["wv"].T.astype(compute_dtype), "bv": p["bv"].astype(f32),
        "wo": p["wo"].T.astype(compute_dtype), "bo": p["bo"].astype(f32),
        "w1": p["w1"].T.astype(compute_dtype), "b1": p["b1"].astype(f32),
        "w2": p["w2"].T.astype(compute_dtype), "b2": p["b2"].astype(f32),
        "gamma": p["gamma"].astype(f32),
        "beta": p["beta"].astype(f32),
    }


def attention_pooler(x, pp, *, block_b=16):
    """x: (B, L, D) float32, pp: prepare_params(...) output -> (B, D) float32."""
    B, L, D = x.shape
    cdt = pp["wk"].dtype

    # Batch tile: multiple of 8 (sublane-dense f32 output); TB*L >= 128 rows
    # is ideal for the K/V projection matmuls.
    TB = min(block_b, ((B + 7) // 8) * 8)
    n_blocks = pl.cdiv(B, TB)
    B_pad = n_blocks * TB
    if B_pad != B:
        x = jnp.pad(x, ((0, B_pad - B), (0, 0), (0, 0)))   # zero rows, sliced off below
    x_flat = x.reshape(B_pad * L, D).astype(cdt)

    def const(shape):
        # Whole-array block, same block index for every grid step (no re-fetch).
        return pl.BlockSpec(shape, lambda b: (0, 0))

    in_specs = [
        pl.BlockSpec((TB * L, D), lambda b: (b, 0)),   # x rows of this batch tile
        const((1, D)),                                  # pre-scaled query projection
        const((D, D)), const((1, D)),                   # Wk^T, bk
        const((D, D)), const((1, D)),                   # Wv^T, bv
        const((D, D)), const((1, D)),                   # Wo^T, bo
        const((D, D)), const((1, D)),                   # W1^T, b1
        const((D, D)), const((1, D)),                   # W2^T, b2
        const((1, D)), const((1, D)),                   # LN gamma, beta
    ]

    out = pl.pallas_call(
        attention_pooler_kernel,
        out_shape=jax.ShapeDtypeStruct((B_pad, D), jnp.float32),
        grid_spec=pltpu.PrefetchScalarGridSpec(
            num_scalar_prefetch=0,
            grid=(n_blocks,),
            in_specs=in_specs,
            out_specs=pl.BlockSpec((TB, D), lambda b: (b, 0)),
        ),
        compiler_params=pltpu.CompilerParams(
            dimension_semantics=("parallel",),          # shards batch tiles across v7x TCs
        ),
    )(
        x_flat, pp["qp"],
        pp["wk"], pp["bk"], pp["wv"], pp["bv"],
        pp["wo"], pp["bo"],
        pp["w1"], pp["b1"], pp["w2"], pp["b2"],
        pp["gamma"], pp["beta"],
    )
    return out[:B] if B_pad != B else out


def reference(x, p):
    """Pure-JAX f32 reference mirroring the PyTorch forward (eval mode)."""
    B, L, D = x.shape
    q = jnp.broadcast_to(p["query"], (B, 1, D))
    qp = q @ p["wq"].T + p["bq"]
    kp = x @ p["wk"].T + p["bk"]
    vp = x @ p["wv"].T + p["bv"]
    scores = jnp.einsum("bqd,bkd->bqk", qp, kp) / math.sqrt(D)
    attn = jax.nn.softmax(scores, axis=-1)
    ctx = jnp.einsum("bqk,bkd->bqd", attn, vp)
    a = ctx @ p["wo"].T + p["bo"]
    h = jax.nn.relu(a @ p["w1"].T + p["b1"])
    h = h @ p["w2"].T + p["b2"]
    mean = jnp.mean(h, axis=-1, keepdims=True)
    var = jnp.mean((h - mean) ** 2, axis=-1, keepdims=True)
    h = (h - mean) / jnp.sqrt(var + 1e-5) * p["gamma"] + p["beta"]
    return h[:, 0, :]


def init_params(key, D):
    ks = jax.random.split(key, 12)
    s = 0.05  # small deterministic scale, keeps numerics tame
    return {
        # nn.Parameter(1,1,D) xavier_normal_ — stored flat as (1, D)
        "query": jax.random.normal(ks[0], (1, D), jnp.float32) * math.sqrt(2.0 / (D + 1)),
        # PyTorch Linear layout (out, in); in_proj split into q/k/v
        "wq": jax.random.normal(ks[1], (D, D), jnp.float32) * s,
        "wk": jax.random.normal(ks[2], (D, D), jnp.float32) * s,
        "wv": jax.random.normal(ks[3], (D, D), jnp.float32) * s,
        "bq": jax.random.normal(ks[4], (1, D), jnp.float32) * s,
        "bk": jax.random.normal(ks[5], (1, D), jnp.float32) * s,
        "bv": jax.random.normal(ks[6], (1, D), jnp.float32) * s,
        "wo": jax.random.normal(ks[7], (D, D), jnp.float32) * s,
        "bo": jax.random.normal(ks[8], (1, D), jnp.float32) * s,
        "w1": jax.random.normal(ks[9], (D, D), jnp.float32) * s,
        "b1": jnp.zeros((1, D), jnp.float32),
        "w2": jax.random.normal(ks[10], (D, D), jnp.float32) * s,
        "b2": jnp.zeros((1, D), jnp.float32),
        "gamma": jnp.ones((1, D), jnp.float32),
        "beta": jnp.zeros((1, D), jnp.float32),
    }


if __name__ == "__main__":
    # B=20 deliberately not divisible by the batch tile (TB=16) to exercise the
    # padding path; L=8, D=128 keeps TB*L = 128 MXU rows per grid step.
    B, L, D = 20, 8, 128
    key = jax.random.PRNGKey(0)
    kx, kparam = jax.random.split(key)
    x = jax.random.normal(kx, (B, L, D), jnp.float32)
    params = init_params(kparam, D)
    ref = reference(x, params)

    # f32 compute path. Only deviation from the exact f32 reference is the EUP
    # approximate reciprocal in the softmax normalization (rel err << 1e-2).
    pp_f32 = prepare_params(params, jnp.float32)
    out = attention_pooler(x, pp_f32, block_b=16)
    jax.block_until_ready(out)
    assert out.shape == (B, D)
    assert bool(jnp.all(jnp.isfinite(out)))
    assert jnp.allclose(out, ref, atol=2e-2, rtol=2e-2), "f32 kernel mismatch vs reference"

    # bf16 MXU-input path (recommended on v6e/v7x); f32 accumulation + f32
    # softmax/LayerNorm, so this is a loose sanity check only.
    pp_bf16 = prepare_params(params, jnp.bfloat16)
    out_bf16 = attention_pooler(x, pp_bf16, block_b=16)
    jax.block_until_ready(out_bf16)
    assert out_bf16.shape == (B, D)
    assert bool(jnp.all(jnp.isfinite(out_bf16)))
    assert jnp.allclose(out_bf16, ref, atol=0.25, rtol=0.25), "bf16 kernel diverged"

    print("KERNEL_OK")
</pallas_src>

<mosaic_0001>
module attributes {stable_mosaic.version = 11 : i64} {
  func.func @attention_pooler_kernel(%arg0: i32, %arg1: memref<128x128xf32, #tpu.memory_space<vmem>>, %arg2: memref<1x128xf32, #tpu.memory_space<vmem>>, %arg3: memref<128x128xf32, #tpu.memory_space<vmem>>, %arg4: memref<1x128xf32, #tpu.memory_space<vmem>>, %arg5: memref<128x128xf32, #tpu.memory_space<vmem>>, %arg6: memref<1x128xf32, #tpu.memory_space<vmem>>, %arg7: memref<128x128xf32, #tpu.memory_space<vmem>>, %arg8: memref<1x128xf32, #tpu.memory_space<vmem>>, %arg9: memref<128x128xf32, #tpu.memory_space<vmem>>, %arg10: memref<1x128xf32, #tpu.memory_space<vmem>>, %arg11: memref<128x128xf32, #tpu.memory_space<vmem>>, %arg12: memref<1x128xf32, #tpu.memory_space<vmem>>, %arg13: memref<1x128xf32, #tpu.memory_space<vmem>>, %arg14: memref<1x128xf32, #tpu.memory_space<vmem>>, %arg15: memref<16x128xf32, #tpu.memory_space<vmem>>) attributes {dimension_semantics = [#tpu.dimension_semantics<parallel>], iteration_bounds = array<i64: 2>, scalar_prefetch = 0 : i64, scratch_operands = 0 : i64, tpu.core_type = #tpu.core_type<tc>, window_params = [{transform_indices = @transform_0, window_bounds = array<i64: 128, 128>}, {pipeline_mode = #tpu.pipeline_mode<synchronous>, transform_indices = @transform_1, window_bounds = array<i64: 1, 128>}, {pipeline_mode = #tpu.pipeline_mode<synchronous>, transform_indices = @transform_2, window_bounds = array<i64: 128, 128>}, {pipeline_mode = #tpu.pipeline_mode<synchronous>, transform_indices = @transform_3, window_bounds = array<i64: 1, 128>}, {pipeline_mode = #tpu.pipeline_mode<synchronous>, transform_indices = @transform_4, window_bounds = array<i64: 128, 128>}, {pipeline_mode = #tpu.pipeline_mode<synchronous>, transform_indices = @transform_5, window_bounds = array<i64: 1, 128>}, {pipeline_mode = #tpu.pipeline_mode<synchronous>, transform_indices = @transform_6, window_bounds = array<i64: 128, 128>}, {pipeline_mode = #tpu.pipeline_mode<synchronous>, transform_indices = @transform_7, window_bounds = array<i64: 1, 128>}, {pipeline_mode = #tpu.pipeline_mode<synchronous>, transform_indices = @transform_8, window_bounds = array<i64: 128, 128>}, {pipeline_mode = #tpu.pipeline_mode<synchronous>, transform_indices = @transform_9, window_bounds = array<i64: 1, 128>}, {pipeline_mode = #tpu.pipeline_mode<synchronous>, transform_indices = @transform_10, window_bounds = array<i64: 128, 128>}, {pipeline_mode = #tpu.pipeline_mode<synchronous>, transform_indices = @transform_11, window_bounds = array<i64: 1, 128>}, {pipeline_mode = #tpu.pipeline_mode<synchronous>, transform_indices = @transform_12, window_bounds = array<i64: 1, 128>}, {pipeline_mode = #tpu.pipeline_mode<synchronous>, transform_indices = @transform_13, window_bounds = array<i64: 1, 128>}, {transform_indices = @transform_14, window_bounds = array<i64: 16, 128>}]} {
    %c0 = arith.constant 0 : index
    %c0_0 = arith.constant 0 : index
    %0 = vector.load %arg1[%c0, %c0_0] : memref<128x128xf32, #tpu.memory_space<vmem>>, vector<128x128xf32>
    %c0_1 = arith.constant 0 : index
    %c0_2 = arith.constant 0 : index
    %1 = vector.load %arg3[%c0_1, %c0_2] : memref<128x128xf32, #tpu.memory_space<vmem>>, vector<128x128xf32>
    %cst = arith.constant dense<0.000000e+00> : vector<128x128xf32>
    %2 = tpu.matmul %0, %1, %cst {dimension_numbers = #tpu.dot_dimension_numbers<[1], [0], [0], [1], [0, 0, 1, 1], [], []>} : vector<128x128xf32>, vector<128x128xf32>, vector<128x128xf32> -> vector<128x128xf32>
    %c0_3 = arith.constant 0 : index
    %c0_4 = arith.constant 0 : index
    %3 = vector.load %arg4[%c0_3, %c0_4] : memref<1x128xf32, #tpu.memory_space<vmem>>, vector<1x128xf32>
    %4 = vector.broadcast %3 : vector<1x128xf32> to vector<128x128xf32>
    %5 = arith.addf %2, %4 : vector<128x128xf32>
    %c0_5 = arith.constant 0 : index
    %c0_6 = arith.constant 0 : index
    %6 = vector.load %arg5[%c0_5, %c0_6] : memref<128x128xf32, #tpu.memory_space<vmem>>, vector<128x128xf32>
    %cst_7 = arith.constant dense<0.000000e+00> : vector<128x128xf32>
    %7 = tpu.matmul %0, %6, %cst_7 {dimension_numbers = #tpu.dot_dimension_numbers<[1], [0], [0], [1], [0, 0, 1, 1], [], []>} : vector<128x128xf32>, vector<128x128xf32>, vector<128x128xf32> -> vector<128x128xf32>
    %c0_8 = arith.constant 0 : index
    %c0_9 = arith.constant 0 : index
    %8 = vector.load %arg6[%c0_8, %c0_9] : memref<1x128xf32, #tpu.memory_space<vmem>>, vector<1x128xf32>
    %9 = vector.broadcast %8 : vector<1x128xf32> to vector<128x128xf32>
    %10 = arith.addf %7, %9 : vector<128x128xf32>
    %11 = vector.shape_cast %5 : vector<128x128xf32> to vector<16x8x128xf32>
    %12 = vector.shape_cast %10 : vector<128x128xf32> to vector<16x8x128xf32>
    %c0_10 = arith.constant 0 : index
    %c0_11 = arith.constant 0 : index
    %13 = vector.load %arg2[%c0_10, %c0_11] : memref<1x128xf32, #tpu.memory_space<vmem>>, vector<1x128xf32>
    %14 = vector.shape_cast %13 : vector<1x128xf32> to vector<1x1x128xf32>
    %15 = vector.broadcast %14 : vector<1x1x128xf32> to vector<16x8x128xf32>
    %16 = arith.mulf %11, %15 : vector<16x8x128xf32>
    %cst_12 = arith.constant dense<0.000000e+00> : vector<16x8xf32>
    %17 = vector.multi_reduction <add>, %16, %cst_12 [2] : vector<16x8x128xf32> to vector<16x8xf32>
    %cst_13 = arith.constant dense<0xFF800000> : vector<16xf32>
    %18 = vector.multi_reduction <maximumf>, %17, %cst_13 [1] : vector<16x8xf32> to vector<16xf32>
    %19 = vector.shape_cast %18 : vector<16xf32> to vector<16x1xf32>
    %20 = vector.broadcast %19 : vector<16x1xf32> to vector<16x8xf32>
    %21 = arith.subf %17, %20 : vector<16x8xf32>
    %22 = math.exp %21 : vector<16x8xf32>
    %cst_14 = arith.constant dense<0.000000e+00> : vector<16xf32>
    %23 = vector.multi_reduction <add>, %22, %cst_14 [1] : vector<16x8xf32> to vector<16xf32>
    %24 = vector.shape_cast %23 : vector<16xf32> to vector<16x1xf32>
    %25 = tpu.reciprocal %24 {approx = true} : vector<16x1xf32> -> vector<16x1xf32>
    %26 = vector.broadcast %25 : vector<16x1xf32> to vector<16x8xf32>
    %27 = arith.mulf %22, %26 : vector<16x8xf32>
    %28 = vector.shape_cast %27 : vector<16x8xf32> to vector<16x8x1xf32>
    %29 = vector.broadcast %28 : vector<16x8x1xf32> to vector<16x8x128xf32>
    %30 = arith.mulf %29, %12 : vector<16x8x128xf32>
    %cst_15 = arith.constant dense<0.000000e+00> : vector<16x128xf32>
    %31 = vector.multi_reduction <add>, %30, %cst_15 [1] : vector<16x8x128xf32> to vector<16x128xf32>
    %c0_16 = arith.constant 0 : index
    %c0_17 = arith.constant 0 : index
    %32 = vector.load %arg7[%c0_16, %c0_17] : memref<128x128xf32, #tpu.memory_space<vmem>>, vector<128x128xf32>
    %cst_18 = arith.constant dense<0.000000e+00> : vector<16x128xf32>
    %33 = tpu.matmul %31, %32, %cst_18 {dimension_numbers = #tpu.dot_dimension_numbers<[1], [0], [0], [1], [0, 0, 1, 1], [], []>} : vector<16x128xf32>, vector<128x128xf32>, vector<16x128xf32> -> vector<16x128xf32>
    %c0_19 = arith.constant 0 : index
    %c0_20 = arith.constant 0 : index
    %34 = vector.load %arg8[%c0_19, %c0_20] : memref<1x128xf32, #tpu.memory_space<vmem>>, vector<1x128xf32>
    %35 = vector.broadcast %34 : vector<1x128xf32> to vector<16x128xf32>
    %36 = arith.addf %33, %35 : vector<16x128xf32>
    %c0_21 = arith.constant 0 : index
    %c0_22 = arith.constant 0 : index
    %37 = vector.load %arg9[%c0_21, %c0_22] : memref<128x128xf32, #tpu.memory_space<vmem>>, vector<128x128xf32>
    %cst_23 = arith.constant dense<0.000000e+00> : vector<16x128xf32>
    %38 = tpu.matmul %36, %37, %cst_23 {dimension_numbers = #tpu.dot_dimension_numbers<[1], [0], [0], [1], [0, 0, 1, 1], [], []>} : vector<16x128xf32>, vector<128x128xf32>, vector<16x128xf32> -> vector<16x128xf32>
    %c0_24 = arith.constant 0 : index
    %c0_25 = arith.constant 0 : index
    %39 = vector.load %arg10[%c0_24, %c0_25] : memref<1x128xf32, #tpu.memory_space<vmem>>, vector<1x128xf32>
    %40 = vector.broadcast %39 : vector<1x128xf32> to vector<16x128xf32>
    %41 = arith.addf %38, %40 : vector<16x128xf32>
    %cst_26 = arith.constant 0.000000e+00 : f32
    %42 = vector.broadcast %cst_26 : f32 to vector<16x128xf32>
    %43 = arith.maximumf %41, %42 : vector<16x128xf32>
    %c0_27 = arith.constant 0 : index
    %c0_28 = arith.constant 0 : index
    %44 = vector.load %arg11[%c0_27, %c0_28] : memref<128x128xf32, #tpu.memory_space<vmem>>, vector<128x128xf32>
    %cst_29 = arith.constant dense<0.000000e+00> : vector<16x128xf32>
    %45 = tpu.matmul %43, %44, %cst_29 {dimension_numbers = #tpu.dot_dimension_numbers<[1], [0], [0], [1], [0, 0, 1, 1], [], []>} : vector<16x128xf32>, vector<128x128xf32>, vector<16x128xf32> -> vector<16x128xf32>
    %c0_30 = arith.constant 0 : index
    %c0_31 = arith.constant 0 : index
    %46 = vector.load %arg12[%c0_30, %c0_31] : memref<1x128xf32, #tpu.memory_space<vmem>>, vector<1x128xf32>
    %47 = vector.broadcast %46 : vector<1x128xf32> to vector<16x128xf32>
    %48 = arith.addf %45, %47 : vector<16x128xf32>
    %cst_32 = arith.constant dense<0.000000e+00> : vector<16xf32>
    %49 = vector.multi_reduction <add>, %48, %cst_32 [1] : vector<16x128xf32> to vector<16xf32>
    %50 = vector.shape_cast %49 : vector<16xf32> to vector<16x1xf32>
    %cst_33 = arith.constant 1.280000e+02 : f32
    %51 = vector.broadcast %cst_33 : f32 to vector<16x1xf32>
    %52 = arith.divf %50, %51 : vector<16x1xf32>
    %53 = vector.broadcast %52 : vector<16x1xf32> to vector<16x128xf32>
    %54 = arith.subf %48, %53 : vector<16x128xf32>
    %55 = arith.mulf %54, %54 : vector<16x128xf32>
    %cst_34 = arith.constant dense<0.000000e+00> : vector<16xf32>
    %56 = vector.multi_reduction <add>, %55, %cst_34 [1] : vector<16x128xf32> to vector<16xf32>
    %57 = vector.shape_cast %56 : vector<16xf32> to vector<16x1xf32>
    %cst_35 = arith.constant 1.280000e+02 : f32
    %58 = vector.broadcast %cst_35 : f32 to vector<16x1xf32>
    %59 = arith.divf %57, %58 : vector<16x1xf32>
    %60 = vector.broadcast %52 : vector<16x1xf32> to vector<16x128xf32>
    %61 = arith.subf %48, %60 : vector<16x128xf32>
    %cst_36 = arith.constant 9.99999974E-6 : f32
    %62 = vector.broadcast %cst_36 : f32 to vector<16x1xf32>
    %63 = arith.addf %59, %62 : vector<16x1xf32>
    %64 = math.rsqrt %63 : vector<16x1xf32>
    %65 = vector.broadcast %64 : vector<16x1xf32> to vector<16x128xf32>
    %66 = arith.mulf %61, %65 : vector<16x128xf32>
    %c0_37 = arith.constant 0 : index
    %c0_38 = arith.constant 0 : index
    %67 = vector.load %arg13[%c0_37, %c0_38] : memref<1x128xf32, #tpu.memory_space<vmem>>, vector<1x128xf32>
    %68 = vector.broadcast %67 : vector<1x128xf32> to vector<16x128xf32>
    %69 = arith.mulf %66, %68 : vector<16x128xf32>
    %c0_39 = arith.constant 0 : index
    %c0_40 = arith.constant 0 : index
    %70 = vector.load %arg14[%c0_39, %c0_40] : memref<1x128xf32, #tpu.memory_space<vmem>>, vector<1x128xf32>
    %71 = vector.broadcast %70 : vector<1x128xf32> to vector<16x128xf32>
    %72 = arith.addf %69, %71 : vector<16x128xf32>
    %c0_41 = arith.constant 0 : index
    %c0_42 = arith.constant 0 : index
    %73 = vector.load %arg15[%c0_41, %c0_42] : memref<16x128xf32, #tpu.memory_space<vmem>>, vector<16x128xf32>
    tpu.vector_store %arg15[%c0_41, %c0_42], %72 {strides = array<i32>} : memref<16x128xf32, #tpu.memory_space<vmem>>, vector<16x128xf32>,
    return
  }
  func.func @transform_0(%arg0: i32) -> (i32, i32) {
    %c0_i32 = arith.constant 0 : i32
    %c0_i32_0 = arith.constant 0 : i32
    return %arg0, %c0_i32 : i32, i32
  }
  func.func @transform_1(%arg0: i32) -> (i32, i32) {
    %c0_i32 = arith.constant 0 : i32
    %c0_i32_0 = arith.constant 0 : i32
    %c0_i32_1 = arith.constant 0 : i32
    return %c0_i32, %c0_i32_0 : i32, i32
  }
  func.func @transform_2(%arg0: i32) -> (i32, i32) {
    %c0_i32 = arith.constant 0 : i32
    %c0_i32_0 = arith.constant 0 : i32
    %c0_i32_1 = arith.constant 0 : i32
    return %c0_i32, %c0_i32_0 : i32, i32
  }
  func.func @transform_3(%arg0: i32) -> (i32, i32) {
    %c0_i32 = arith.constant 0 : i32
    %c0_i32_0 = arith.constant 0 : i32
    %c0_i32_1 = arith.constant 0 : i32
    return %c0_i32, %c0_i32_0 : i32, i32
  }
  func.func @transform_4(%arg0: i32) -> (i32, i32) {
    %c0_i32 = arith.constant 0 : i32
    %c0_i32_0 = arith.constant 0 : i32
    %c0_i32_1 = arith.constant 0 : i32
    return %c0_i32, %c0_i32_0 : i32, i32
  }
  func.func @transform_5(%arg0: i32) -> (i32, i32) {
    %c0_i32 = arith.constant 0 : i32
    %c0_i32_0 = arith.constant 0 : i32
    %c0_i32_1 = arith.constant 0 : i32
    return %c0_i32, %c0_i32_0 : i32, i32
  }
  func.func @transform_6(%arg0: i32) -> (i32, i32) {
    %c0_i32 = arith.constant 0 : i32
    %c0_i32_0 = arith.constant 0 : i32
    %c0_i32_1 = arith.constant 0 : i32
    return %c0_i32, %c0_i32_0 : i32, i32
  }
  func.func @transform_7(%arg0: i32) -> (i32, i32) {
    %c0_i32 = arith.constant 0 : i32
    %c0_i32_0 = arith.constant 0 : i32
    %c0_i32_1 = arith.constant 0 : i32
    return %c0_i32, %c0_i32_0 : i32, i32
  }
  func.func @transform_8(%arg0: i32) -> (i32, i32) {
    %c0_i32 = arith.constant 0 : i32
    %c0_i32_0 = arith.constant 0 : i32
    %c0_i32_1 = arith.constant 0 : i32
    return %c0_i32, %c0_i32_0 : i32, i32
  }
  func.func @transform_9(%arg0: i32) -> (i32, i32) {
    %c0_i32 = arith.constant 0 : i32
    %c0_i32_0 = arith.constant 0 : i32
    %c0_i32_1 = arith.constant 0 : i32
    return %c0_i32, %c0_i32_0 : i32, i32
  }
  func.func @transform_10(%arg0: i32) -> (i32, i32) {
    %c0_i32 = arith.constant 0 : i32
    %c0_i32_0 = arith.constant 0 : i32
    %c0_i32_1 = arith.constant 0 : i32
    return %c0_i32, %c0_i32_0 : i32, i32
  }
  func.func @transform_11(%arg0: i32) -> (i32, i32) {
    %c0_i32 = arith.constant 0 : i32
    %c0_i32_0 = arith.constant 0 : i32
    %c0_i32_1 = arith.constant 0 : i32
    return %c0_i32, %c0_i32_0 : i32, i32
  }
  func.func @transform_12(%arg0: i32) -> (i32, i32) {
    %c0_i32 = arith.constant 0 : i32
    %c0_i32_0 = arith.constant 0 : i32
    %c0_i32_1 = arith.constant 0 : i32
    return %c0_i32, %c0_i32_0 : i32, i32
  }
  func.func @transform_13(%arg0: i32) -> (i32, i32) {
    %c0_i32 = arith.constant 0 : i32
    %c0_i32_0 = arith.constant 0 : i32
    %c0_i32_1 = arith.constant 0 : i32
    return %c0_i32, %c0_i32_0 : i32, i32
  }
  func.func @transform_14(%arg0: i32) -> (i32, i32) {
    %c0_i32 = arith.constant 0 : i32
    %c0_i32_0 = arith.constant 0 : i32
    return %arg0, %c0_i32 : i32, i32
  }
}

</mosaic_0001>

<bundles_post_ra>
// kernel: tpu_custom_call.1
= control target key start
LH: loop header
LB: loop body
LE: loop exit
PB: predicated region body
PF: predicated region fallthrough
CT: control target
= control target key end

     0   :  { %s3633_s0 = inlined_call_operand.hbm [shape: f32[256,128], index: 0, kind: input, shape index: {}]   ;;  %s3634_s1 = inlined_call_operand.vmem [shape: f32[1,128], index: 1, kind: input, shape index: {}]   ;;  %s3635_s2 = inlined_call_operand.hbm [shape: f32[128,128], index: 2, kind: input, shape index: {}]   ;;  %s3636_s3 = inlined_call_operand.vmem [shape: f32[1,128], index: 3, kind: input, shape index: {}]   ;;  %s3637_s4 = inlined_call_operand.hbm [shape: f32[128,128], index: 4, kind: input, shape index: {}]   ;;  %s3638_s5 = inlined_call_operand.vmem [shape: f32[1,128], index: 5, kind: input, shape index: {}]   ;;  %s3639_s6 = inlined_call_operand.hbm [shape: f32[128,128], index: 6, kind: input, shape index: {}]   ;;  %s3640_s7 = inlined_call_operand.vmem [shape: f32[1,128], index: 7, kind: input, shape index: {}]   ;;  %s3641_s8 = inlined_call_operand.hbm [shape: f32[128,128], index: 8, kind: input, shape index: {}]   ;;  %s3642_s9 = inlined_call_operand.vmem [shape: f32[1,128], index: 9, kind: input, shape index: {}]   ;;  %s3643_s10 = inlined_call_operand.hbm [shape: f32[128,128], index: 10, kind: input, shape index: {}]   ;;  %s3644_s11 = inlined_call_operand.vmem [shape: f32[1,128], index: 11, kind: input, shape index: {}]   ;;  %s3645_s12 = inlined_call_operand.vmem [shape: f32[1,128], index: 12, kind: input, shape index: {}]   ;;  %s3646_s13 = inlined_call_operand.vmem [shape: f32[1,128], index: 13, kind: input, shape index: {}]   ;;  %s3647_s14 = inlined_call_operand.hbm [shape: f32[32,128], index: 14, kind: output, shape index: {}]  }
   0x1   :  { %3656 = sst [smem:[#allocation21_spill]] %s3635_s2 }
   0x2   :  { %3657 = sst [smem:[#allocation22_spill]] %s3637_s4 }
   0x3   :  { %3658 = sst [smem:[#allocation23_spill]] %s3639_s6 }
   0x4   :  { %3659 = sst [smem:[#allocation24_spill]] %s3641_s8 }
   0x5   :  { %3660 = sst [smem:[#allocation25_spill]] %s3643_s10 }
   0x6   :  { %3661 = sst [smem:[#allocation26_spill]] %s3647_s14 }
   0x7   :  { %19 = vsyncpa [#allocation3], 0 }
   0x8   :  { %21 = vsyncpa [#allocation3 + $0x1], 0 }
   0x9   :  { %22 = vsyncpa [#allocation6], 0 }
   0xa   :  { %23 = vsyncpa [#allocation9], 0 }
   0xb   :  { %24 = vsyncpa [#allocation12], 0 }
   0xc   :  { %25 = vsyncpa [#allocation4], 0 }
   0xd   :  { %27 = vsyncpa [#allocation4 + $0x1], 0  ;;  %s2994_s29 = smov 0   ;;  %s2996_s30 = smov 0  }
   0xe   :  { %s2998_s15 = smov 0   ;;  %s3000_s16 = smov 0  }
   0xf LB: > { %3662 = sst [smem:[#allocation19_spill]] %s2901_s15  ;;  %s2907_s17 = smov [#allocation5]   ;;  %s2905_s16 = sphi %s3000_s16, %s3694_s16   ;;  %s2901_s15 = sphi %s2998_s15, %s3691_s15   ;;  %s2897_s30 = sphi %s2996_s30, %s3693_s30   ;;  %s2893_s29 = sphi %s2994_s29, %s3692_s29  }
  0x10   : > { %s378_s18 = sshll.u32 %s2907_s17, 4  ;;  %s3015_s19 = sadd.s32 4294967295, %s2905_s16   ;;  %s379_s18 = int_to_ptr.vmem [resolvable:$true] %s378_s18 }
  0x11   : > { %p2159_p0 = scmp.ge.s32.totalorder %s2905_s16, 1  ;;  %p3651_p1 = scmp.eq.s32.totalorder %s3015_s19, 0 }
  0x12   : > { %p363_p2 = scmp.lt.s32.totalorder %s2905_s16, 3  ;;  %s2908_s21 = smov [#allocation8]  }
  0x13   : > { %s410_s22 = sshll.u32 %s2908_s21, 4  ;;  %s2909_s24 = smov [#allocation7]   ;;  %s3033_s22 = int_to_ptr.vmem [resolvable:$true] %s410_s22 }
  0x14   : > { %p3020_p3 = pnand %p2159_p0, %p363_p2  ;;  %s394_s25 = sshll.u32 %s2909_s24, 4  ;;  %s3035_s25 = int_to_ptr.vmem [resolvable:$true] %s394_s25 }
  0x15   : > { %s2682_s27 = scalar_lea.vmem %s379_s18, 2048  ;;  %p2690_p11 = scmp.lt.s32.totalorder %s379_s18, %s379_s18 }
  0x16   : > { %s3663_s20 = scalar_select %p3020_p3, 1, 0 }
  0x17   : > { %p2551_p5 = pneg %p3020_p3  ;;  %p2683_p8 = scmp.ne.s32.totalorder %s379_s18, %s2682_s27 }
  0x18   : > { %p2691_p12 = scmp.lt.s32.totalorder %s2682_s27, %s2682_s27 }
  0x19   : > { %p3029_p6 = pnand %p2551_p5, %p3651_p1 }
  0x1a   : > { %p2692_p13 = por %p2691_p12, %p2690_p11 }
  0x1b   : > { %p3039_p7 = pneg %p3029_p6 }
  0x1d   : > { %p2685_p9 = pnand %p2683_p8, %p3039_p7 }
  0x1f   : > { %p2686_p10 = pneg %p2685_p9 }
  0x21   : > { %p2693_p0 = pnand %p2692_p13, %p2686_p10 }
  0x23   : > { %2696 = shalt.err (!%p2693_p0)
}
  0x24   : > { %s3649_s28 = smov 128   ;;  %s3650_s17 = smov 8  }
  0x25   : > { %s3666_s2 = sld [smem:[#allocation21_spill]]  ;;  %s2708_s14 = scalar_lea.vmem %s3033_s22, 2048 }
  0x26   : > { %p2709_p2 = scmp.ne.s32.totalorder %s3033_s22, %s2708_s14  ;;  %p2716_p9 = scmp.lt.s32.totalorder %s3033_s22, %s3033_s22 }
  0x27   : > { %p2717_p10 = scmp.lt.s32.totalorder %s2708_s14, %s2708_s14 }
  0x28   : > { %p2711_p5 = pnand %p2709_p2, %p3039_p7 }
  0x29   : > { %p2718_p11 = por %p2717_p10, %p2716_p9 }
  0x2a   : > { %p2712_p8 = pneg %p2711_p5 }
  0x2b   : > { %2554 = dma.hbm_to_vmem [thread:$0]  (!%p3029_p6), %s3666_s2, 2048, %s379_s18, [#allocation6], %s3649_s28, %s3649_s28, %s3650_s17  }
  0x2c   : > { %p2719_p12 = pnand %p2718_p11, %p2712_p8 }
  0x2e   : > { %2722 = shalt.err (!%p2719_p12)
}
  0x2f   : > { %s3667_s6 = sld [smem:[#allocation23_spill]]  ;;  %s2734_s18 = scalar_lea.vmem %s3035_s25, 2048 }
  0x30   : > { %p2735_p13 = scmp.ne.s32.totalorder %s3035_s25, %s2734_s18  ;;  %p2742_p5 = scmp.lt.s32.totalorder %s3035_s25, %s3035_s25 }
  0x31   : > { %p2743_p8 = scmp.lt.s32.totalorder %s2734_s18, %s2734_s18 }
  0x32   : > { %p2737_p0 = pnand %p2735_p13, %p3039_p7 }
  0x33   : > { %p2744_p9 = por %p2743_p8, %p2742_p5 }
  0x34   : > { %p2738_p2 = pneg %p2737_p0 }
  0x35   : > { %2560 = dma.hbm_to_vmem [thread:$0]  (!%p3029_p6), %s3667_s6, 2048, %s3033_s22, [#allocation9], %s3649_s28, %s3649_s28, %s3650_s17  }
  0x36   : > { %p2745_p10 = pnand %p2744_p9, %p2738_p2 }
  0x38   : > { %2748 = shalt.err (!%p2745_p10)
}
  0x39   : > { %s3668_s4 = sld [smem:[#allocation22_spill]]  ;;  %s2912_s22 = smov [#allocation10]  }
  0x3a   : > { %s426_s27 = sshll.u32 %s2912_s22, 4  ;;  %s2913_s21 = smov [#allocation11]   ;;  %s427_s27 = int_to_ptr.vmem [resolvable:$true] %s426_s27 }
  0x3b   : > { %s442_s2 = sshll.u32 %s2913_s21, 4  ;;  %s2760_s18 = scalar_lea.vmem %s427_s27, 2048  ;;  %s443_s2 = int_to_ptr.vmem [resolvable:$true] %s442_s2 }
  0x3c   : > { %p2761_p11 = scmp.ne.s32.totalorder %s427_s27, %s2760_s18  ;;  %p2768_p0 = scmp.lt.s32.totalorder %s427_s27, %s427_s27 }
  0x3d   : > { %p2769_p2 = scmp.lt.s32.totalorder %s2760_s18, %s2760_s18 }
  0x3e   : > { %p2763_p12 = pnand %p2761_p11, %p3039_p7 }
  0x3f   : > { %2557 = dma.hbm_to_vmem [thread:$0]  (!%p3029_p6), %s3668_s4, 2048, %s3035_s25, [#allocation6], %s3649_s28, %s3649_s28, %s3650_s17  }
  0x40   : > { %p2764_p13 = pneg %p2763_p12  ;;  %p2770_p5 = por %p2769_p2, %p2768_p0 }
  0x42   : > { %p2771_p8 = pnand %p2770_p5, %p2764_p13 }
  0x44   : > { %2774 = shalt.err (!%p2771_p8)
}
  0x45   : > { %s3669_s8 = sld [smem:[#allocation24_spill]]  ;;  %s2786_s24 = scalar_lea.vmem %s443_s2, 2048 }
  0x46   : > { %p2787_p9 = scmp.ne.s32.totalorder %s443_s2, %s2786_s24  ;;  %p2794_p12 = scmp.lt.s32.totalorder %s443_s2, %s443_s2 }
  0x47   : > { %p2795_p0 = scmp.lt.s32.totalorder %s2786_s24, %s2786_s24 }
  0x48   : > { %p2789_p10 = pnand %p2787_p9, %p3039_p7 }
  0x49   : > { %p2796_p13 = por %p2795_p0, %p2794_p12 }
  0x4a   : > { %p2790_p11 = pneg %p2789_p10 }
  0x4b   : > { %2563 = dma.hbm_to_vmem [thread:$0]  (!%p3029_p6), %s3669_s8, 2048, %s427_s27, [#allocation9], %s3649_s28, %s3649_s28, %s3650_s17  }
  0x4c   : > { %p2797_p2 = pnand %p2796_p13, %p2790_p11 }
  0x4e   : > { %2800 = shalt.err (!%p2797_p2)
}
  0x4f   : > { %s3670_s10 = sld [smem:[#allocation25_spill]]  ;;  %s2158_s23 = sadd.s32 4294967294, %s2905_s16  }
  0x50   : > { %s3105_s26 = sadd.s32 1, %s2905_s16   ;;  %s40_s27 = sadd.s32 1, %s2901_s15 }
  0x51   : > { %s37_s18 = ssub.s32 %s2905_s16, %s3105_s26  ;;  %p47_p7 = scmp.ne.s32.totalorder %s2901_s15, %s2897_s30 }
  0x52   : > { %p38_p5 = scmp.eq.s32.totalorder %s37_s18, 0  ;;  %p48_p8 = scmp.eq.s32.totalorder %s2905_s16, 0 }
  0x53   : > { %p53_p9 = scmp.ne.s32.totalorder %s2897_s30, %s2893_s29  ;;  %p350_p10 = scmp.eq.s32.totalorder %s3015_s19, 1 }
  0x54   : > { %s3117_s25 = scalar_select %p38_p5, %s2901_s15, %s40_s27  }
  0x55   : > { %2566 = dma.hbm_to_vmem [thread:$0]  (!%p3029_p6), %s3670_s10, 2048, %s443_s2, [#allocation12], %s3649_s28, %s3649_s28, %s3650_s17  }
  0x56   : > { %3671 = sst [smem:[#allocation20_spill]] %s3117_s25  ;;  %p49_p11 = por %p48_p8, %p47_p7 }
  0x57   : > { %p3121_p12 = por %p3651_p1, %p53_p9  ;;  %p3125_p6 = por %p350_p10, %p47_p7 }
  0x58   : > { %p356_p0 = scmp.eq.s32.totalorder %s2158_s23, 1  ;;  %p2580_p13 = scmp.lt.s32.totalorder %s2905_s16, 2 }
  0x59   : > { %s3672_s14 = scalar_select %p3121_p12, 1, 0 }
  0x5a   : > { %s3673_s2 = scalar_select %p3125_p6, 1, 0 }
  0x5b   : > { %s465_s24 = sand.u32 1, %s2901_s15   ;;  %p3131_p2 = por %p356_p0, %p53_p9 }
  0x5c   : > { %s2166_s21 = sshll.u32 %s465_s24, 7  ;;  %s2190_s27 = sshll.u32 %s2905_s16, 11 }
  0x5d   : > { %s3674_s22 = scalar_select %p3131_p2, 1, 0 }
  0x5e   : > { %s3139_s17 = scalar_lea.hbm %s3633_s0, %s2190_s27  ;;  %s469_s4 = scalar_lea.vmem [#allocation2], %s2166_s21 }
  0x5f   : > { %s476_s6 = sshll.u32 %s469_s4, 4  ;;  %p3141_p7 = pnand %p2580_p13, %p49_p11  ;;  %s3145_s6 = int_to_ptr.vmem [resolvable:$true] %s476_s6 }
  0x60   : > { %s3147_s8 = scalar_lea.sflag [#allocation3], %s465_s24  ;;  %s2801_s10 = scalar_lea.hbm %s3139_s17, 2048 }
  0x61   : > { %p2802_p5 = scmp.ne.s32.totalorder %s3139_s17, %s2801_s10  ;;  %p2803_p8 = pneg %p3141_p7 }
  0x62   : > { %s2806_s21 = scalar_lea.hbm %s3633_s0, 4096  ;;  %p2807_p11 = scmp.lt.s32.totalorder %s3139_s17, %s3633_s0 }
  0x63   : > { %p2804_p9 = pnand %p2803_p8, %p2802_p5  ;;  %p2808_p0 = scmp.lt.s32.totalorder %s2806_s21, %s2801_s10 }
  0x65   : > { %p2805_p10 = pneg %p2804_p9  ;;  %p2809_p13 = por %p2808_p0, %p2807_p11 }
  0x67   : > { %p2810_p4 = pnand %p2809_p13, %p2805_p10 }
  0x69   : > { %2813 = shalt.err (!%p2810_p4)
}
  0x6a   : > { %s2814_s24 = scalar_lea.vmem %s3145_s6, 2048  ;;  %s2914_s25 = smov [#allocation2]  }
  0x6b   : > { %p2815_p1 = scmp.ne.s32.totalorder %s3145_s6, %s2814_s24  ;;  %s2819_s15 = sshll.u32 %s2914_s25, 4  ;;  %s2820_s15 = int_to_ptr.vmem [resolvable:$false] %s2819_s15 }
  0x6c   : > { %s2821_s28 = scalar_lea.vmem %s2820_s15, 4096  ;;  %p2822_p9 = scmp.lt.s32.totalorder %s3145_s6, %s2820_s15 }
  0x6d   : > { %p2817_p2 = pnand %p2815_p1, %p2803_p8  ;;  %p2823_p6 = scmp.lt.s32.totalorder %s2821_s28, %s2814_s24 }
  0x6f   : > { %p2818_p5 = pneg %p2817_p2  ;;  %p2824_p12 = por %p2823_p6, %p2822_p9 }
  0x71   : > { %p2825_p3 = pnand %p2824_p12, %p2818_p5 }
  0x73   : > { %2828 = shalt.err (!%p2825_p3)
}
  0x74   : > { %s3676_s10 = smov 8   ;;  %s3677_s27 = smov 128  }
  0x75   : > { %2570 = dma.hbm_to_vmem [thread:$0]  (!%p3141_p7), %s3139_s17, 2048, %s3145_s6, %s3147_s8, %s3677_s27, %s3677_s27, %s3676_s10  }
  0x76   : > { %p3678_p1 = scmp.ne.s32.totalorder %s3663_s20, 0 }
  0x77   : > { %s3174_s25 = sand.u32 (!%p3678_p1), 1, %s2897_s30   ;;  %p3679_p3 = scmp.ne.s32.totalorder (!%p3678_p1), %s3672_s14, 0 }
  0x78   : > { %488 = sbr.rel (%p3678_p1) target bundleno = 2095 (0x82f), region = 76  ;;  %s2170_s15 = sshll.u32 (!%p3678_p1), %s3174_s25, 7 }
  0x79   : > { %s491_s21 = scalar_lea.sflag (!%p3678_p1), [#allocation3], %s3174_s25  ;;  %s3178_s4 = scalar_lea.vmem (!%p3678_p1), [#allocation2], %s2170_s15 }
  0x7d   : > { %2872 = dma.done.wait (%p3679_p3), %s491_s21, 2048  }
  0x7e   : > { %2874 = vsyncadd (%p3679_p3), %s491_s21, 4294965248  ;;  %p3680_p4 = scmp.eq.s32.totalorder %s3015_s19, 0 }
  0x80   : > { %2876 = dma.done.wait (%p3680_p4), [#allocation6], 4096   ;;  %p3681_p12 = pmov %p3680_p4 }
  0x81   : > { %p3682_p6 = pmov %p3680_p4 }
  0x82   : > { %2878 = vsyncadd (%p3681_p12), [#allocation6], 4294963200 }
  0x83   : > { %2880 = dma.done.wait (%p3682_p6), [#allocation9], 4096   ;;  %p3683_p2 = pmov %p3680_p4 }
  0x85   : > { %2882 = vsyncadd (%p3683_p2), [#allocation9], 4294963200  ;;  %p3684_p7 = pmov %p3683_p2 }
  0x86   : > { %p3685_p8 = pmov %p3683_p2 }
  0x87   : > { %2884 = dma.done.wait (%p3684_p7), [#allocation12], 2048  }
  0x88   : > { %2886 = vsyncadd (%p3685_p8), [#allocation12], 4294965248  ;;  %v592_v0 = vld [vmem:[#allocation5 + $0x78] sm:$0xff]  ;;  %v591_v1 = vld [vmem:[#allocation5 + $0x70] sm:$0xff]  ;;  %vm1050_vm0 = vcmask 1041409   ;;  %vm1052_vm1 = vcmask 1042434  }
  0x89   : > { %2310 = vmatprep.subr.mxu0 %v592_v0  ;;  %v590_v2 = vld [vmem:[#allocation5 + $0x68] sm:$0xff]  ;;  %v589_v3 = vld [vmem:[#allocation5 + $0x60] sm:$0xff]  ;;  %v588_v5 = vld [vmem:[#allocation5 + $0x58] sm:$0xff]  ;;  %vm1054_vm2 = vcmask 1043459   ;;  %vm1056_vm3 = vcmask 1044484   ;;  %vm1058_vm4 = vcmask 1045509  }
  0x8a   : > { %2311 = vmatpush3.msra.mxu0 %v592_v0  ;;  %v561_v4 = vld [vmem:[%s3178_s4] sm:$0xff]  ;;  %v587_v6 = vld [vmem:[#allocation5 + $0x50] sm:$0xff]  ;;  %v586_v7 = vld [vmem:[#allocation5 + $0x48] sm:$0xff]  ;;  %vm1060_vm5 = vcmask 1046534   ;;  %vm1062_vm6 = vcmask 1047559   ;;  %vm1073_vm7 = vcmask 64512  }
  0x8b   : > { %2312 = vmatprep.subr.mxu0 %v591_v1  ;;  %2342 = vmatprep.mubr.f32.mxu0 %v561_v4  ;;  %v585_v8 = vld [vmem:[#allocation5 + $0x40] sm:$0xff]  ;;  %v584_v9 = vld [vmem:[#allocation5 + $0x38] sm:$0xff]  ;;  %v583_v10 = vld [vmem:[#allocation5 + $0x30] sm:$0xff]  ;;  %s2176_s21 = sshll.u32 %s3174_s25, 4  ;;  %s2191_s17 = sshll.u32 %s3015_s19, 8 }
  0x8c   : > { %2313 = vmatpush3.msra.mxu0 %v591_v1  ;;  %2398 = vmatprep.mubr.f32.mxu1 %v561_v4  ;;  %v582_v11 = vld [vmem:[#allocation5 + $0x28] sm:$0xff]  ;;  %v581_v12 = vld [vmem:[#allocation5 + $0x20] sm:$0xff]  ;;  %v580_v13 = vld [vmem:[#allocation5 + $0x18] sm:$0xff]  ;;  %s558_s14 = scalar_lea.vmem [#allocation13], %s2176_s21  ;;  %s3686_s28 = sld [smem:[#allocation26_spill]] }
  0x8d   : > { %2314 = vmatprep.subr.mxu0 %v590_v2  ;;  %v579_v14 = vld [vmem:[#allocation5 + $0x10] sm:$0xff]  ;;  %v578_v15 = vld [vmem:[#allocation5 + $0x8] sm:$0xff]  ;;  %v577_v16 = vld [vmem:[#allocation5] sm:$0xff]  ;;  %s2037_s23 = sshll.u32 %s558_s14, 4  ;;  %s2024_s27 = scalar_lea.sflag [#allocation4], %s3174_s25  ;;  %s3590_s23 = int_to_ptr.vmem [resolvable:$true] %s2037_s23 }
  0x8e   : > { %2315 = vmatpush3.msra.mxu0 %v590_v2  ;;  %v3198_v17 = vld [vmem:[%s3178_s4 + $0x8] sm:$0xff]  ;;  %v3201_v18 = vld [vmem:[%s3178_s4 + $0x10] sm:$0xff]  ;;  %v3206_v19 = vld [vmem:[%s3178_s4 + $0x18] sm:$0xff]  ;;  %s2829_s15 = scalar_lea.vmem %s3590_s23, 256  ;;  %p3687_p11 = scmp.ne.s32.totalorder %s3673_s2, 0 }
  0x8f   : > { %2316 = vmatprep.subr.mxu0 %v589_v3  ;;  %v3209_v20 = vld [vmem:[%s3178_s4 + $0x20] sm:$0xff]  ;;  %v3214_v21 = vld [vmem:[%s3178_s4 + $0x28] sm:$0xff]  ;;  %v3217_v22 = vld [vmem:[%s3178_s4 + $0x30] sm:$0xff]  ;;  %p2830_p10 = scmp.ne.s32.totalorder %s3590_s23, %s2829_s15  ;;  %s2916_s19 = smov [#allocation13]  }
  0x90   : > { %2317 = vmatpush3.msra.mxu0 %v589_v3  ;;  %v3222_v23 = vld [vmem:[%s3178_s4 + $0x38] sm:$0xff]  ;;  %v3225_v24 = vld [vmem:[%s3178_s4 + $0x40] sm:$0xff]  ;;  %v3230_v25 = vld [vmem:[%s3178_s4 + $0x48] sm:$0xff]  ;;  %s2833_s21 = sshll.u32 %s2916_s19, 4  ;;  %s2834_s21 = int_to_ptr.vmem [resolvable:$false] %s2833_s21 }
  0x91   : > { %2318 = vmatprep.subr.mxu0 %v588_v5  ;;  %v3233_v26 = vld [vmem:[%s3178_s4 + $0x50] sm:$0xff]  ;;  %v3238_v27 = vld [vmem:[%s3178_s4 + $0x58] sm:$0xff]  ;;  %v3241_v28 = vld [vmem:[%s3178_s4 + $0x60] sm:$0xff]  ;;  %p2831_p0 = pnand %p2830_p10, %p3687_p11  ;;  %p2836_p5 = scmp.lt.s32.totalorder %s3590_s23, %s2834_s21 }
  0x92   : > { %2319 = vmatpush3.msra.mxu0 %v588_v5  ;;  %v3246_v29 = vld [vmem:[%s3178_s4 + $0x68] sm:$0xff]  ;;  %v3249_v30 = vld [vmem:[%s3178_s4 + $0x70] sm:$0xff]  ;;  %v3254_v31 = vld [vmem:[%s3178_s4 + $0x78] sm:$0xff]  ;;  %s3588_s10 = scalar_lea.hbm %s3686_s28, %s2191_s17  ;;  %s2835_s4 = scalar_lea.vmem %s2834_s21, 512 }
  0x93   : > { %2320 = vmatprep.subr.mxu0 %v587_v6  ;;  %v2177_v32 = vld [vmem:[%s3636_s3] ss:$0 sm:$0xff]  ;;  %p2832_p13 = pneg %p2831_p0  ;;  %p2837_p9 = scmp.lt.s32.totalorder %s2835_s4, %s2829_s15 }
  0x94   : > { %2321 = vmatpush3.msra.mxu0 %v587_v6  ;;  %v2179_v34 = vld [vmem:[%s3634_s1] ss:$0 sm:$0xff] }
  0x95   : > { %2322 = vmatprep.subr.mxu0 %v586_v7  ;;  %p2838_p1 = por %p2837_p9, %p2836_p5 }
  0x96   : > { %2323 = vmatpush3.msra.mxu0 %v586_v7 }
  0x97   : > { %2324 = vmatprep.subr.mxu0 %v585_v8  ;;  %p2839_p3 = pnand %p2838_p1, %p2832_p13 }
  0x98   : > { %2325 = vmatpush3.msra.mxu0 %v585_v8 }
  0x99   : > { %2326 = vmatprep.subr.mxu0 %v584_v9 }
  0x9a   : > { %2327 = vmatpush3.msra.mxu0 %v584_v9 }
  0x9b   : > { %2328 = vmatprep.subr.mxu0 %v583_v10 }
  0x9c   : > { %2329 = vmatpush3.msra.mxu0 %v583_v10 }
  0x9d   : > { %2330 = vmatprep.subr.mxu0 %v582_v11 }
  0x9e   : > { %2331 = vmatpush3.msra.mxu0 %v582_v11 }
  0x9f   : > { %2332 = vmatprep.subr.mxu0 %v581_v12 }
  0xa0   : > { %2333 = vmatpush3.msra.mxu0 %v581_v12 }
  0xa1   : > { %2334 = vmatprep.subr.mxu0 %v580_v13 }
  0xa2   : > { %2335 = vmatpush3.msra.mxu0 %v580_v13 }
  0xa3   : > { %2336 = vmatprep.subr.mxu0 %v579_v14 }
  0xa4   : > { %2337 = vmatpush3.msra.mxu0 %v579_v14 }
  0xa5   : > { %2338 = vmatprep.subr.mxu0 %v578_v15 }
  0xa6   : > { %2339 = vmatpush3.msra.mxu0 %v578_v15 }
  0xa7   : > { %2340 = vmatprep.subr.mxu0 %v577_v16 }
  0xa8   : > { %2341 = vmatpush3.msra.mxu0 %v577_v16 }
  0xa9   : > { %2343 = vmatmul.mubr.f32.vlgmr.msra.gmra.mxu0 %v3198_v17 }
  0xaa   : > { %2345 = vmatprep.mubr.f32.mxu0 %v3201_v18 }
  0xad   : > { %2346 = vmatmul.mubr.f32.gmra.mxu0 %v3206_v19 }
  0xae   : > { %2348 = vmatprep.mubr.f32.mxu0 %v3209_v20 }
  0xb1   : > { %2349 = vmatmul.mubr.f32.gmra.mxu0 %v3214_v21 }
  0xb2   : > { %2351 = vmatprep.mubr.f32.mxu0 %v3217_v22 }
  0xb5   : > { %2352 = vmatmul.mubr.f32.gmra.mxu0 %v3222_v23 }
  0xb6   : > { %2354 = vmatprep.mubr.f32.mxu0 %v3225_v24 }
  0xb9   : > { %2355 = vmatmul.mubr.f32.gmra.mxu0 %v3230_v25 }
  0xba   : > { %2357 = vmatprep.mubr.f32.mxu0 %v3233_v26 }
  0xbd   : > { %2358 = vmatmul.mubr.f32.gmra.mxu0 %v3238_v27 }
  0xbe   : > { %2360 = vmatprep.mubr.f32.mxu0 %v3241_v28 }
  0xc1   : > { %2361 = vmatmul.mubr.f32.gmra.mxu0 %v3246_v29 }
  0xc2   : > { %2363 = vmatprep.mubr.f32.mxu0 %v3249_v30 }
  0xc5   : > { %2364 = vmatmul.mubr.f32.gmra.mxu0 %v3254_v31 }
 0x169   : > { %v2344_v33 = vpop.f32.mrf.mxu0 }
 0x16a   : > { %v672_v35 = vadd.f32 %v2344_v33, %v2177_v32 }
 0x16b   : > { %v666_v36 = vpop.f32.mrf.mxu0 }
 0x16c   : > { %v667_v37 = vadd.f32 %v2177_v32, %v666_v36  ;;  %v921_v38 = vmul.f32 %v2179_v34, %v672_v35 }
 0x16d   : > { %v2347_v39 = vpop.f32.mrf.mxu0 }
 0x16e   : > { %v682_v40 = vadd.f32 %v2347_v39, %v2177_v32  ;;  %938 = vadd.xlane.f32.xlu0 %v921_v38  ;;  %v920_v44 = vmul.f32 %v2179_v34, %v667_v37  ;;  %v984_v37 = vlaneseq }
 0x16f   : > { %v676_v41 = vpop.f32.mrf.mxu0 }
 0x170   : > { %v677_v42 = vadd.f32 %v2177_v32, %v676_v41  ;;  %v923_v43 = vmul.f32 %v2179_v34, %v682_v40  ;;  %v985_v39 = vand.u32 127, %v984_v37  ;;  %v3269_v40 = vshrl.u32 %v984_v37, 7 }
 0x171   : > { %v2350_v45 = vpop.f32.mrf.mxu0 }
 0x172   : > { %v692_v46 = vadd.f32 %v2350_v45, %v2177_v32  ;;  %942 = vadd.xlane.f32.xlu1 %v923_v43  ;;  %936 = vadd.xlane.f32.xlu0 %v920_v44  ;;  %v922_v48 = vmul.f32 %v2179_v34, %v677_v42 }
 0x173   : > { %v686_v47 = vpop.f32.mrf.mxu0 }
 0x174   : > { %v925_v50 = vmul.f32 %v2179_v34, %v692_v46  ;;  %v687_v52 = vadd.f32 %v2177_v32, %v686_v47 }
 0x175   : > { %v2353_v49 = vpop.f32.mrf.mxu0 }
 0x176   : > { %940 = vadd.xlane.f32.xlu1 %v922_v48  ;;  %v924_v57 = vmul.f32 %v2179_v34, %v687_v52  ;;  %v702_v6 = vadd.f32 %v2353_v49, %v2177_v32 }
 0x177   : > { %v696_v51 = vpop.f32.mrf.mxu0 }
 0x178   : > { %v697_v56 = vadd.f32 %v2177_v32, %v696_v51  ;;  %v927_v13 = vmul.f32 %v2179_v34, %v702_v6 }
 0x179   : > { %v2356_v53 = vpop.f32.mrf.mxu0 }
 0x17a   : > { %v712_v54 = vadd.f32 %v2356_v53, %v2177_v32  ;;  %946 = vadd.xlane.f32.xlu1 %v925_v50  ;;  %v926_v0 = vmul.f32 %v2179_v34, %v697_v56 }
 0x17b   : > { %v706_v55 = vpop.f32.mrf.mxu0 }
 0x17c   : > { %v929_v58 = vmul.f32 %v2179_v34, %v712_v54  ;;  %v707_v62 = vadd.f32 %v2177_v32, %v706_v55 }
 0x17d   : > { %v2359_v59 = vpop.f32.mrf.mxu0 }
 0x17e   : > { %v722_v60 = vadd.f32 %v2359_v59, %v2177_v32  ;;  %944 = vadd.xlane.f32.xlu1 %v924_v57  ;;  %954 = vadd.xlane.f32.xlu0 %v929_v58  ;;  %v928_v7 = vmul.f32 %v2179_v34, %v707_v62 }
 0x17f   : > { %v716_v61 = vpop.f32.mrf.mxu0 }
 0x180   : > { %v717_v63 = vadd.f32 %v2177_v32, %v716_v61  ;;  %v931_v1 = vmul.f32 %v2179_v34, %v722_v60 }
 0x181   : > { %v2362_v2 = vpop.f32.mrf.mxu0 }
 0x182   : > { %948 = vadd.xlane.f32.xlu1 %v926_v0  ;;  %958 = vadd.xlane.f32.xlu0 %v931_v1  ;;  %v732_v3 = vadd.f32 %v2362_v2, %v2177_v32  ;;  %v930_v4 = vmul.f32 %v2179_v34, %v717_v63 }
 0x183   : > { %v726_v5 = vpop.f32.mrf.mxu0 }
 0x184   : > { %v727_v9 = vadd.f32 %v2177_v32, %v726_v5  ;;  %v933_v10 = vmul.f32 %v2179_v34, %v732_v3 }
 0x185   : > { %v2365_v8 = vpop.f32.mrf.mxu0 }
 0x186   : > { %952 = vadd.xlane.f32.xlu1 %v928_v7  ;;  %956 = vadd.xlane.f32.xlu0 %v930_v4  ;;  %v742_v11 = vadd.f32 %v2365_v8, %v2177_v32  ;;  %v932_v15 = vmul.f32 %v2179_v34, %v727_v9 }
 0x187   : > { %v736_v12 = vpop.f32.mrf.mxu0 }
 0x188   : > { %v737_v14 = vadd.f32 %v2177_v32, %v736_v12  ;;  %v935_v16 = vmul.f32 %v2179_v34, %v742_v11  ;;  %v3276_v32 = vsub.s32 %v985_v39, %v3269_v40 }
 0x18a   : > { %950 = vadd.xlane.f32.xlu1 %v927_v13  ;;  %962 = vadd.xlane.f32.xlu0 %v933_v10  ;;  %v934_v33 = vmul.f32 %v2179_v34, %v737_v14 }
 0x18e   : > { %960 = vadd.xlane.f32.xlu0 %v932_v15  ;;  %966 = vadd.xlane.f32.xlu1 %v935_v16 }
 0x192   : > { %964 = vadd.xlane.f32.xlu0 %v934_v33 }
 0x1f7   : > { %v3265_v36 = vpop.xlane.xlu0 %938 }
 0x1f8   : > { %v993_v46 = vrot.slane %v3265_v36, %v3276_v32 }
 0x1fb   : > { %v3263_v35 = vpop.xlane.xlu1 %942  ;;  %v3271_v41 = vpop.xlane.xlu0 %936 }
 0x1fc   : > { %v989_v44 = vrot.slane %v3271_v41, %v3276_v32  ;;  %v1001_v52 = vrot.slane %v3263_v35, %v3276_v32 }
 0x1fe   : > { %v1051_v49 = vsel %vm1050_vm0, %v993_v46, %v989_v44  ;;  %v3346_v46 = vsub.s32 0, %v3269_v40 }
 0x1ff   : > { %v3267_v38 = vpop.xlane.xlu1 %940 }
 0x200   : > { %v997_v45 = vrot.slane %v3267_v38, %v3276_v32 }
 0x202   : > { %v1053_v50 = vsel %vm1052_vm1, %v997_v45, %v1051_v49  ;;  %v2915_v45 = vmov 0   ;;  %v3349_v49 = vsub.s32 1, %v3269_v40 }
 0x203   : > { %v3273_v42 = vpop.xlane.xlu1 %946  ;;  %v1055_v55 = vsel %vm1054_vm2, %v1001_v52, %v1053_v50  ;;  %2630 = vset.pattern.permute.xlu1 %v2915_v45  ;;  %2629 = vset.pattern.permute.xlu0 %v2915_v45  ;;  %v3352_v50 = vsub.s32 2, %v3269_v40  ;;  %v3358_v52 = vsub.s32 3, %v3269_v40 }
 0x204   : > { %v1009_v60 = vrot.slane %v3273_v42, %v3276_v32 }
 0x207   : > { %v3278_v34 = vpop.xlane.xlu1 %944  ;;  %v3280_v43 = vpop.xlane.xlu0 %954 }
 0x208   : > { %v1005_v51 = vrot.slane %v3278_v34, %v3276_v32  ;;  %v1025_v58 = vrot.slane %v3280_v43, %v3276_v32 }
 0x20a   : > { %v1057_v57 = vsel %vm1056_vm3, %v1005_v51, %v1055_v55  ;;  %v3355_v51 = vsub.s32 5, %v3269_v40  ;;  %v3361_v55 = vsub.s32 6, %v3269_v40 }
 0x20b   : > { %v3288_v47 = vpop.xlane.xlu1 %948  ;;  %v3290_v48 = vpop.xlane.xlu0 %958  ;;  %v1059_v2 = vsel %vm1058_vm4, %v1009_v60, %v1057_v57  ;;  %v3367_v60 = vsub.s32 4, %v3269_v40 }
 0x20c   : > { %v1013_v59 = vrot.slane %v3288_v47, %v3276_v32  ;;  %v1033_v3 = vrot.slane %v3290_v48, %v3276_v32 }
 0x20e   : > { %v1061_v4 = vsel %vm1060_vm5, %v1013_v59, %v1059_v2 }
 0x20f   : > { %v3298_v53 = vpop.xlane.xlu1 %952  ;;  %v3300_v54 = vpop.xlane.xlu0 %956 }
 0x210   : > { %v1021_v56 = vrot.slane %v3298_v53, %v3276_v32  ;;  %v1029_v61 = vrot.slane %v3300_v54, %v3276_v32 }
 0x212   : > { %v1064_v62 = vsel %vm1050_vm0, %v1025_v58, %v1021_v56 }
 0x213   : > { %v3315_v63 = vpop.xlane.xlu1 %950  ;;  %v3317_v0 = vpop.xlane.xlu0 %962  ;;  %v1065_v5 = vsel %vm1052_vm1, %v1029_v61, %v1064_v62 }
 0x214   : > { %v1017_v1 = vrot.slane %v3315_v63, %v3276_v32  ;;  %v1041_v11 = vrot.slane %v3317_v0, %v3276_v32  ;;  %v1066_v12 = vsel %vm1054_vm2, %v1033_v3, %v1065_v5 }
 0x216   : > { %v1063_v6 = vsel %vm1062_vm6, %v1017_v1, %v1061_v4  ;;  %v3375_v4 = vsub.s32 7, %v3269_v40 }
 0x217   : > { %v3327_v7 = vpop.xlane.xlu0 %960  ;;  %v1074_v8 = vsel %vm1073_vm7, %v1063_v6, -inf  ;;  %v967_v10 = vpop.xlane.xlu1 %966 }
 0x218   : > { %v1037_v9 = vrot.slane %v3327_v7, %v3276_v32  ;;  %1075 = vmax.xlane.f32.xlu0 %v1074_v8  ;;  %v1049_v15 = vrot.slane %v967_v10, %v3276_v32 }
 0x21a   : > { %v1067_v13 = vsel %vm1056_vm3, %v1037_v9, %v1066_v12 }
 0x21b   : > { %v3336_v14 = vpop.xlane.xlu0 %964  ;;  %v1068_v33 = vsel %vm1058_vm4, %v1041_v11, %v1067_v13 }
 0x21c   : > { %v1045_v16 = vrot.slane %v3336_v14, %v3276_v32 }
 0x21e   : > { %v1069_v37 = vsel %vm1060_vm5, %v1045_v16, %v1068_v33 }
 0x21f   : > { %v1070_v39 = vsel %vm1062_vm6, %v1049_v15, %v1069_v37 }
 0x220   : > { %v1077_v44 = vsel %vm1073_vm7, %v1070_v39, -inf }
 0x221   : > { %1078 = vmax.xlane.f32.xlu1 %v1077_v44 }
 0x2a1   : > { %v1076_v56 = vpop.xlane.xlu0 %1075 }
 0x2a2   : > { %v1085_v57 = vrot.slane %v1076_v56, %v3346_v46  ;;  %v1089_v58 = vrot.slane %v1076_v56, %v3349_v49  ;;  %v1093_v59 = vrot.slane %v1076_v56, %v3352_v50  ;;  %v1105_v61 = vrot.slane %v1076_v56, %v3355_v51 }
 0x2a3   : > { %v1097_v62 = vrot.slane %v1076_v56, %v3358_v52  ;;  %v1109_v5 = vrot.slane %v1076_v56, %v3361_v55  ;;  %v1101_v11 = vrot.slane %v1076_v56, %v3367_v60 }
 0x2a4   : > { %v1162_v1 = vsub.f32 %v3271_v41, %v1085_v57  ;;  %v1163_v2 = vsub.f32 %v3265_v36, %v1089_v58  ;;  %v1164_v3 = vsub.f32 %v3267_v38, %v1093_v59  ;;  %v1167_v6 = vsub.f32 %v3273_v42, %v1105_v61 }
 0x2a5   : > { %v1165_v12 = vsub.f32 %v3263_v35, %v1097_v62  ;;  %v1113_v41 = vrot.slane %v1076_v56, %v3375_v4  ;;  %v1168_v36 = vsub.f32 %v3288_v47, %v1109_v5  ;;  %v1166_v15 = vsub.f32 %v3278_v34, %v1101_v11 }
 0x2a6   : > { %v1178_v8 = vmul.f32 1.442695, %v1162_v1  ;;  %v1180_v9 = vmul.f32 1.442695, %v1163_v2  ;;  %v1182_v13 = vmul.f32 1.442695, %v1164_v3 }
 0x2a7   : > { %v1188_v38 = vmul.f32 1.442695, %v1167_v6  ;;  %v1184_v16 = vmul.f32 1.442695, %v1165_v12  ;;  %v1169_v33 = vsub.f32 %v3315_v63, %v1113_v41  ;;  %v1190_v37 = vmul.f32 1.442695, %v1168_v36 }
 0x2a8   : > { %2631 = vpow2.f32 %v1178_v8  ;;  %v1186_v39 = vmul.f32 1.442695, %v1166_v15 }
 0x2a9   : > { %2633 = vpow2.f32 %v1180_v9  ;;  %v1192_v47 = vmul.f32 1.442695, %v1169_v33 }
 0x2aa   : > { %v1079_v40 = vpop.xlane.xlu1 %1078  ;;  %2635 = vpow2.f32 %v1182_v13 }
 0x2ab   : > { %v1117_v42 = vrot.slane %v1079_v40, %v3346_v46  ;;  %2637 = vpow2.f32 %v1188_v38  ;;  %v1145_v35 = vrot.slane %v1079_v40, %v3375_v4  ;;  %v1121_v45 = vrot.slane %v1079_v40, %v3349_v49 }
 0x2ac   : > { %2639 = vpow2.f32 %v1184_v16  ;;  %v1125_v63 = vrot.slane %v1079_v40, %v3352_v50  ;;  %v1133_v3 = vrot.slane %v1079_v40, %v3367_v60  ;;  %v1137_v9 = vrot.slane %v1079_v40, %v3355_v51 }
 0x2ad   : > { %v1170_v44 = vsub.f32 %v3298_v53, %v1117_v42  ;;  %2641 = vpow2.f32 %v1190_v37  ;;  %v1177_v56 = vsub.f32 %v967_v10, %v1145_v35  ;;  %v1171_v58 = vsub.f32 %v3280_v43, %v1121_v45  ;;  %v757_v45 = vld [vmem:[#allocation7 + $0x60] sm:$0xff] }
 0x2ae   : > { %2643 = vpow2.f32 %v1186_v39  ;;  %v1129_v10 = vrot.slane %v1079_v40, %v3358_v52  ;;  %v1172_v62 = vsub.f32 %v3300_v54, %v1125_v63  ;;  %v1174_v11 = vsub.f32 %v3327_v7, %v1133_v3  ;;  %v760_v39 = vld [vmem:[#allocation7 + $0x78] sm:$0xff]  ;;  %v754_v63 = vld [vmem:[#allocation7 + $0x48] sm:$0xff] }
 0x2af   : > { %v1194_v34 = vmul.f32 1.442695, %v1170_v44  ;;  %2645 = vpow2.f32 %v1192_v47  ;;  %v1208_v59 = vmul.f32 1.442695, %v1177_v56  ;;  %v1196_v1 = vmul.f32 1.442695, %v1171_v58  ;;  %2366 = vmatprep.subr.mxu1 %v760_v39 }
 0x2b0   : > { %v1173_v5 = vsub.f32 %v3290_v48, %v1129_v10  ;;  %v1198_v6 = vmul.f32 1.442695, %v1172_v62  ;;  %v1141_v41 = vrot.slane %v1079_v40, %v3361_v55  ;;  %v1175_v36 = vsub.f32 %v3317_v0, %v1137_v9  ;;  %v759_v44 = vld [vmem:[#allocation7 + $0x70] sm:$0xff]  ;;  %2367 = vmatpush3.msra.mxu1 %v760_v39  ;;  %v758_v47 = vld [vmem:[#allocation7 + $0x68] sm:$0xff]  ;;  %v756_v56 = vld [vmem:[#allocation7 + $0x58] sm:$0xff] }
 0x2b1   : > { %2647 = vpow2.f32 %v1194_v34  ;;  %v1202_v38 = vmul.f32 1.442695, %v1174_v11  ;;  %2368 = vmatprep.subr.mxu1 %v759_v44  ;;  %v755_v34 = vld [vmem:[#allocation7 + $0x50] sm:$0xff]  ;;  %v753_v58 = vld [vmem:[#allocation7 + $0x40] sm:$0xff]  ;;  %v750_v62 = vld [vmem:[#allocation7 + $0x28] sm:$0xff] }
 0x2b2   : > { %2649 = vpow2.f32 %v1208_v59  ;;  %v1200_v12 = vmul.f32 1.442695, %v1173_v5  ;;  %v1176_v7 = vsub.f32 %v3336_v14, %v1141_v41  ;;  %v1204_v16 = vmul.f32 1.442695, %v1175_v36  ;;  %2369 = vmatpush3.msra.mxu1 %v759_v44  ;;  %v752_v59 = vld [vmem:[#allocation7 + $0x38] sm:$0xff]  ;;  %v751_v10 = vld [vmem:[#allocation7 + $0x30] sm:$0xff] }
 0x2b3   : > { %2651 = vpow2.f32 %v1196_v1  ;;  %2370 = vmatprep.subr.mxu1 %v758_v47  ;;  %v749_v1 = vld [vmem:[#allocation7 + $0x20] sm:$0xff]  ;;  %v748_v3 = vld [vmem:[#allocation7 + $0x18] sm:$0xff]  ;;  %v747_v5 = vld [vmem:[#allocation7 + $0x10] sm:$0xff] }
 0x2b4   : > { %2653 = vpow2.f32 %v1198_v6  ;;  %v1206_v40 = vmul.f32 1.442695, %v1176_v7  ;;  %2371 = vmatpush3.msra.mxu1 %v758_v47  ;;  %v746_v6 = vld [vmem:[#allocation7 + $0x8] sm:$0xff]  ;;  %v745_v9 = vld [vmem:[#allocation7] sm:$0xff] }
 0x2b5   : > { %v3389_v57 = vpop.eup %2631  ;;  %2655 = vpow2.f32 %v1200_v12  ;;  %2372 = vmatprep.subr.mxu1 %v757_v45 }
 0x2b6   : > { %v3393_v61 = vpop.eup %2633  ;;  %1227 = vperm.xlu0 %2629, %v3389_v57   ;;  %2657 = vpow2.f32 %v1202_v38  ;;  %2373 = vmatpush3.msra.mxu1 %v757_v45 }
 0x2b7   : > { %1230 = vperm.xlu1 %2630, %v3393_v61   ;;  %v3397_v53 = vpop.eup %2635  ;;  %2659 = vpow2.f32 %v1204_v16  ;;  %2374 = vmatprep.subr.mxu1 %v756_v56 }
 0x2b8   : > { %v3401_v2 = vpop.eup %2637  ;;  %2661 = vpow2.f32 %v1206_v40  ;;  %2375 = vmatpush3.msra.mxu1 %v756_v56 }
 0x2b9   : > { %v3405_v43 = vpop.eup %2639  ;;  %2376 = vmatprep.subr.mxu1 %v755_v34 }
 0x2ba   : > { %1242 = vperm.xlu0 %2629, %v3401_v2   ;;  %v3409_v8 = vpop.eup %2641  ;;  %2377 = vmatpush3.msra.mxu1 %v755_v34 }
 0x2bb   : > { %1233 = vperm.xlu1 %2630, %v3397_v53   ;;  %v3413_v54 = vpop.eup %2643  ;;  %2378 = vmatprep.subr.mxu1 %v754_v63 }
 0x2bc   : > { %v3417_v13 = vpop.eup %2645  ;;  %2379 = vmatpush3.msra.mxu1 %v754_v63 }
 0x2bd   : > { %2380 = vmatprep.subr.mxu1 %v753_v58 }
 0x2be   : > { %1245 = vperm.xlu0 %2629, %v3409_v8   ;;  %v3421_v48 = vpop.eup %2647  ;;  %2381 = vmatpush3.msra.mxu1 %v753_v58 }
 0x2bf   : > { %1236 = vperm.xlu1 %2630, %v3405_v43   ;;  %v3425_v15 = vpop.eup %2649  ;;  %2382 = vmatprep.subr.mxu1 %v752_v59 }
 0x2c0   : > { %v3430_v42 = vpop.eup %2651  ;;  %2383 = vmatpush3.msra.mxu1 %v752_v59 }
 0x2c1   : > { %v3433_v33 = vpop.eup %2653  ;;  %2384 = vmatprep.subr.mxu1 %v751_v10 }
 0x2c2   : > { %1248 = vperm.xlu0 %2629, %v3417_v13   ;;  %v3436_v0 = vpop.eup %2655  ;;  %2385 = vmatpush3.msra.mxu1 %v751_v10 }
 0x2c3   : > { %1239 = vperm.xlu1 %2630, %v3413_v54   ;;  %v3439_v37 = vpop.eup %2657  ;;  %2386 = vmatprep.subr.mxu1 %v750_v62 }
 0x2c4   : > { %v3442_v14 = vpop.eup %2659  ;;  %2387 = vmatpush3.msra.mxu1 %v750_v62 }
 0x2c5   : > { %v3445_v35 = vpop.eup %2661  ;;  %2388 = vmatprep.subr.mxu1 %v749_v1 }
 0x2c6   : > { %1272 = vperm.xlu0 %2629, %v3425_v15   ;;  %2389 = vmatpush3.msra.mxu1 %v749_v1 }
 0x2c7   : > { %1251 = vperm.xlu1 %2630, %v3421_v48   ;;  %2390 = vmatprep.subr.mxu1 %v748_v3 }
 0x2c8   : > { %2391 = vmatpush3.msra.mxu1 %v748_v3 }
 0x2c9   : > { %2392 = vmatprep.subr.mxu1 %v747_v5 }
 0x2ca   : > { %2393 = vmatpush3.msra.mxu1 %v747_v5 }
 0x2cb   : > { %1254 = vperm.xlu1 %2630, %v3430_v42   ;;  %2394 = vmatprep.subr.mxu1 %v746_v6 }
 0x2cc   : > { %2395 = vmatpush3.msra.mxu1 %v746_v6 }
 0x2cd   : > { %2396 = vmatprep.subr.mxu1 %v745_v9 }
 0x2ce   : > { %2397 = vmatpush3.msra.mxu1 %v745_v9 }
 0x2cf   : > { %1257 = vperm.xlu1 %2630, %v3433_v33   ;;  %2399 = vmatmul.mubr.f32.vlgmr.msra.gmra.mxu1 %v3198_v17 }
 0x2d0   : > { %2401 = vmatprep.mubr.f32.mxu1 %v3201_v18 }
 0x2d3   : > { %1260 = vperm.xlu1 %2630, %v3436_v0   ;;  %2402 = vmatmul.mubr.f32.gmra.mxu1 %v3206_v19 }
 0x2d4   : > { %2404 = vmatprep.mubr.f32.mxu1 %v3209_v20 }
 0x2d7   : > { %1263 = vperm.xlu1 %2630, %v3439_v37   ;;  %2405 = vmatmul.mubr.f32.gmra.mxu1 %v3214_v21 }
 0x2d8   : > { %2407 = vmatprep.mubr.f32.mxu1 %v3217_v22 }
 0x2db   : > { %1266 = vperm.xlu1 %2630, %v3442_v14   ;;  %2408 = vmatmul.mubr.f32.gmra.mxu1 %v3222_v23 }
 0x2dc   : > { %2410 = vmatprep.mubr.f32.mxu1 %v3225_v24 }
 0x2df   : > { %1269 = vperm.xlu1 %2630, %v3445_v35   ;;  %2411 = vmatmul.mubr.f32.gmra.mxu1 %v3230_v25 }
 0x2e0   : > { %2413 = vmatprep.mubr.f32.mxu1 %v3233_v26 }
 0x2e3   : > { %2414 = vmatmul.mubr.f32.gmra.mxu1 %v3238_v27 }
 0x2e4   : > { %2416 = vmatprep.mubr.f32.mxu1 %v3241_v28 }
 0x2e7   : > { %2417 = vmatmul.mubr.f32.gmra.mxu1 %v3246_v29 }
 0x2e8   : > { %2419 = vmatprep.mubr.f32.mxu1 %v3249_v30 }
 0x2eb   : > { %2420 = vmatmul.mubr.f32.gmra.mxu1 %v3254_v31 }
 0x331   : > { %v1228_v17 = vpop.permute.xlu0 %1227 }
 0x332   : > { %v1231_v18 = vpop.permute.xlu1 %1230  ;;  %v1277_v22 = vrot.slane %v1228_v17, %v3276_v32 }
 0x333   : > { %v1281_v21 = vrot.slane %v1231_v18, %v3276_v32 }
 0x335   : > { %v1243_v20 = vpop.permute.xlu0 %1242  ;;  %v1338_v27 = vsel %vm1050_vm0, %v1281_v21, %v1277_v22 }
 0x336   : > { %v1234_v19 = vpop.permute.xlu1 %1233  ;;  %v1297_v11 = vrot.slane %v1243_v20, %v3276_v32 }
 0x337   : > { %v1285_v25 = vrot.slane %v1234_v19, %v3276_v32 }
 0x339   : > { %v1246_v24 = vpop.permute.xlu0 %1245  ;;  %v1339_v29 = vsel %vm1052_vm1, %v1285_v25, %v1338_v27 }
 0x33a   : > { %v1237_v23 = vpop.permute.xlu1 %1236  ;;  %v1301_v41 = vrot.slane %v1246_v24, %v3276_v32 }
 0x33b   : > { %v1289_v26 = vrot.slane %v1237_v23, %v3276_v32 }
 0x33d   : > { %v1249_v31 = vpop.permute.xlu0 %1248  ;;  %v1340_v12 = vsel %vm1054_vm2, %v1289_v26, %v1339_v29 }
 0x33e   : > { %v1240_v28 = vpop.permute.xlu1 %1239  ;;  %v1305_v38 = vrot.slane %v1249_v31, %v3276_v32 }
 0x33f   : > { %v1293_v30 = vrot.slane %v1240_v28, %v3276_v32 }
 0x341   : > { %v1341_v36 = vsel %vm1056_vm3, %v1293_v30, %v1340_v12  ;;  %v1273_v6 = vpop.permute.xlu0 %1272 }
 0x342   : > { %v1252_v7 = vpop.permute.xlu1 %1251  ;;  %v1342_v16 = vsel %vm1058_vm4, %v1297_v11, %v1341_v36  ;;  %v1337_v21 = vrot.slane %v1273_v6, %v3276_v32  ;;  %v1795_v6 = vld [vmem:[#allocation10 + $0x68] sm:$0xff] }
 0x343   : > { %v1343_v40 = vsel %vm1060_vm5, %v1301_v41, %v1342_v16  ;;  %v1309_v59 = vrot.slane %v1252_v7, %v3276_v32 }
 0x344   : > { %v1344_v39 = vsel %vm1062_vm6, %v1305_v38, %v1343_v40 }
 0x345   : > { %v1354_v44 = vsel %vm1073_vm7, %v1344_v39, 0.0 }
 0x346   : > { %v1255_v47 = vpop.permute.xlu1 %1254  ;;  %1355 = vadd.xlane.f32.xlu1 %v1354_v44 }
 0x347   : > { %v1313_v63 = vrot.slane %v1255_v47, %v3276_v32 }
 0x349   : > { %v1345_v3 = vsel %vm1050_vm0, %v1313_v63, %v1309_v59  ;;  %v1662_v63 = vld [vmem:[#allocation8 + $0x50] sm:$0xff]  ;;  %v1657_v59 = vld [vmem:[#allocation8 + $0x28] sm:$0xff] }
 0x34a   : > { %v1258_v45 = vpop.permute.xlu1 %1257 }
 0x34b   : > { %v1317_v58 = vrot.slane %v1258_v45, %v3276_v32 }
 0x34d   : > { %v1346_v9 = vsel %vm1052_vm1, %v1317_v58, %v1345_v3  ;;  %v1660_v58 = vld [vmem:[#allocation8 + $0x40] sm:$0xff]  ;;  %v1796_v3 = vld [vmem:[#allocation10 + $0x70] sm:$0xff] }
 0x34e   : > { %v1261_v56 = vpop.permute.xlu1 %1260 }
 0x34f   : > { %v1321_v10 = vrot.slane %v1261_v56, %v3276_v32 }
 0x351   : > { %v1347_v17 = vsel %vm1054_vm2, %v1321_v10, %v1346_v9  ;;  %v1656_v10 = vld [vmem:[#allocation8 + $0x20] sm:$0xff] }
 0x352   : > { %v1264_v34 = vpop.permute.xlu1 %1263  ;;  %v1652_v9 = vld [vmem:[#allocation8] sm:$0xff] }
 0x353   : > { %v1325_v1 = vrot.slane %v1264_v34, %v3276_v32  ;;  %v1666_v34 = vld [vmem:[#allocation8 + $0x70] sm:$0xff] }
 0x355   : > { %v1348_v19 = vsel %vm1056_vm3, %v1325_v1, %v1347_v17  ;;  %v1797_v1 = vld [vmem:[#allocation10 + $0x78] sm:$0xff]  ;;  %v1794_v17 = vld [vmem:[#allocation10 + $0x60] sm:$0xff] }
 0x356   : > { %v1267_v62 = vpop.permute.xlu1 %1266  ;;  %2457 = vmatprep.subr.mxu1 %v1797_v1 }
 0x357   : > { %v1329_v5 = vrot.slane %v1267_v62, %v3276_v32  ;;  %v1654_v62 = vld [vmem:[#allocation8 + $0x10] sm:$0xff]  ;;  %2458 = vmatpush3.msra.mxu1 %v1797_v1 }
 0x358   : > { %2459 = vmatprep.subr.mxu1 %v1796_v3 }
 0x359   : > { %v1349_v22 = vsel %vm1058_vm4, %v1329_v5, %v1348_v19  ;;  %v1653_v5 = vld [vmem:[#allocation8 + $0x8] sm:$0xff]  ;;  %2460 = vmatpush3.msra.mxu1 %v1796_v3  ;;  %v1792_v19 = vld [vmem:[#allocation10 + $0x50] sm:$0xff] }
 0x35a   : > { %v1270_v18 = vpop.permute.xlu1 %1269  ;;  %2461 = vmatprep.subr.mxu1 %v1795_v6 }
 0x35b   : > { %v1333_v20 = vrot.slane %v1270_v18, %v3276_v32  ;;  %2462 = vmatpush3.msra.mxu1 %v1795_v6  ;;  %v1793_v18 = vld [vmem:[#allocation10 + $0x58] sm:$0xff] }
 0x35c   : > { %2463 = vmatprep.subr.mxu1 %v1794_v17 }
 0x35d   : > { %v1350_v23 = vsel %vm1060_vm5, %v1333_v20, %v1349_v22  ;;  %2464 = vmatpush3.msra.mxu1 %v1794_v17  ;;  %v1791_v20 = vld [vmem:[#allocation10 + $0x48] sm:$0xff]  ;;  %v1789_v22 = vld [vmem:[#allocation10 + $0x38] sm:$0xff] }
 0x35e   : > { %v1351_v24 = vsel %vm1062_vm6, %v1337_v21, %v1350_v23  ;;  %2465 = vmatprep.subr.mxu1 %v1793_v18  ;;  %v1790_v21 = vld [vmem:[#allocation10 + $0x40] sm:$0xff]  ;;  %v1788_v23 = vld [vmem:[#allocation10 + $0x30] sm:$0xff] }
 0x35f   : > { %v1357_v25 = vsel %vm1073_vm7, %v1351_v24, 0.0  ;;  %2466 = vmatpush3.msra.mxu1 %v1793_v18  ;;  %v1787_v24 = vld [vmem:[#allocation10 + $0x28] sm:$0xff] }
 0x360   : > { %1358 = vadd.xlane.f32.xlu0 %v1357_v25  ;;  %2467 = vmatprep.subr.mxu1 %v1792_v19  ;;  %v1786_v25 = vld [vmem:[#allocation10 + $0x20] sm:$0xff] }
 0x361   : > { %2468 = vmatpush3.msra.mxu1 %v1792_v19 }
 0x362   : > { %2469 = vmatprep.subr.mxu1 %v1791_v20 }
 0x363   : > { %2470 = vmatpush3.msra.mxu1 %v1791_v20 }
 0x364   : > { %2471 = vmatprep.subr.mxu1 %v1790_v21 }
 0x365   : > { %2472 = vmatpush3.msra.mxu1 %v1790_v21 }
 0x366   : > { %2473 = vmatprep.subr.mxu1 %v1789_v22 }
 0x367   : > { %2474 = vmatpush3.msra.mxu1 %v1789_v22 }
 0x368   : > { %2475 = vmatprep.subr.mxu1 %v1788_v23 }
 0x369   : > { %2476 = vmatpush3.msra.mxu1 %v1788_v23 }
 0x36a   : > { %2477 = vmatprep.subr.mxu1 %v1787_v24 }
 0x36b   : > { %2478 = vmatpush3.msra.mxu1 %v1787_v24 }
 0x36c   : > { %2479 = vmatprep.subr.mxu1 %v1786_v25 }
 0x36d   : > { %2480 = vmatpush3.msra.mxu1 %v1786_v25 }
 0x3cf   : > { %v1356_v26 = vpop.xlane.xlu1 %1355 }
 0x3d0   : > { %2663 = vrcp.f32 %v1356_v26  ;;  %v1785_v26 = vld [vmem:[#allocation10 + $0x18] sm:$0xff] }
 0x3d1   : > { %2481 = vmatprep.subr.mxu1 %v1785_v26 }
 0x3d2   : > { %2482 = vmatpush3.msra.mxu1 %v1785_v26 }
 0x3dd   : > { %v2664_v27 = vpop.eup %2663 }
 0x3de   : > { %v1371_v28 = vrot.slane %v2664_v27, %v3349_v49  ;;  %v1367_v29 = vrot.slane %v2664_v27, %v3346_v46  ;;  %v1375_v31 = vrot.slane %v2664_v27, %v3352_v50  ;;  %v1379_v11 = vrot.slane %v2664_v27, %v3358_v52 }
 0x3df   : > { %v1383_v36 = vrot.slane %v2664_v27, %v3367_v60  ;;  %v1391_v16 = vrot.slane %v2664_v27, %v3361_v55  ;;  %v1395_v45 = vrot.slane %v2664_v27, %v3375_v4 }
 0x3e0   : > { %v1445_v30 = vmul.f32 %v3393_v61, %v1371_v28  ;;  %v1444_v32 = vmul.f32 %v3389_v57, %v1367_v29  ;;  %v1446_v12 = vmul.f32 %v3397_v53, %v1375_v31  ;;  %v1447_v41 = vmul.f32 %v3405_v43, %v1379_v11  ;;  %v2400_v28 = vpop.f32.mrf.mxu1 }
 0x3e1   : > { %v1448_v38 = vmul.f32 %v3413_v54, %v1383_v36  ;;  %v1387_v61 = vrot.slane %v2664_v27, %v3355_v51  ;;  %v1450_v53 = vmul.f32 %v3409_v8, %v1391_v16  ;;  %v1451_v8 = vmul.f32 %v3417_v13, %v1395_v45  ;;  %v1784_v27 = vld [vmem:[#allocation10 + $0x10] sm:$0xff] }
 0x3e2   : > { %1467 = vperm.xlu1 %2630, %v1445_v30   ;;  %1462 = vperm.xlu0 %2629, %v1444_v32   ;;  %v834_v29 = vpop.f32.mrf.mxu1 }
 0x3e3   : > { %v1449_v57 = vmul.f32 %v3401_v2, %v1387_v61  ;;  %2483 = vmatprep.subr.mxu1 %v1784_v27 }
 0x3e4   : > { %2484 = vmatpush3.msra.mxu1 %v1784_v27  ;;  %v2403_v30 = vpop.f32.mrf.mxu1 }
 0x3e6   : > { %1472 = vperm.xlu1 %2630, %v1446_v12   ;;  %1477 = vperm.xlu0 %2629, %v1447_v41   ;;  %v844_v32 = vpop.f32.mrf.mxu1  ;;  %v3530_v12 = vld [vmem:[%s3638_s5] ss:$0 sm:$0xff] }
 0x3e7   : > { %v840_v61 = vadd.f32 %v2400_v28, %v3530_v12  ;;  %v845_v16 = vadd.f32 %v3530_v12, %v844_v32 }
 0x3e8   : > { %v2406_v31 = vpop.f32.mrf.mxu1 }
 0x3e9   : > { %v1359_v7 = vpop.xlane.xlu0 %1358 }
 0x3ea   : > { %2665 = vrcp.f32 %v1359_v7  ;;  %1482 = vperm.xlu0 %2629, %v1448_v38   ;;  %v854_v11 = vpop.f32.mrf.mxu1  ;;  %v835_v7 = vadd.f32 %v3530_v12, %v834_v29 }
 0x3ec   : > { %v3532_v41 = vpop.f32.mrf.mxu1 }
 0x3ee   : > { %1487 = vperm.xlu0 %2629, %v1449_v57   ;;  %v864_v57 = vpop.f32.mrf.mxu1 }
 0x3f2   : > { %1492 = vperm.xlu0 %2629, %v1450_v53  }
 0x3f7   : > { %v2666_v43 = vpop.eup %2665 }
 0x3f8   : > { %v1403_v40 = vrot.slane %v2666_v43, %v3349_v49  ;;  %v1399_v39 = vrot.slane %v2666_v43, %v3346_v46  ;;  %v1407_v47 = vrot.slane %v2666_v43, %v3352_v50  ;;  %v1411_v56 = vrot.slane %v2666_v43, %v3358_v52 }
 0x3f9   : > { %v1427_v49 = vrot.slane %v2666_v43, %v3375_v4  ;;  %v1415_v50 = vrot.slane %v2666_v43, %v3367_v60  ;;  %v1419_v52 = vrot.slane %v2666_v43, %v3355_v51  ;;  %v1665_v4 = vld [vmem:[#allocation8 + $0x68] sm:$0xff]  ;;  %v1423_v60 = vrot.slane %v2666_v43, %v3361_v55  ;;  %v1658_v55 = vld [vmem:[#allocation8 + $0x30] sm:$0xff] }
 0x3fa   : > { %v1453_v54 = vmul.f32 %v3430_v42, %v1403_v40  ;;  %v1452_v44 = vmul.f32 %v3421_v48, %v1399_v39  ;;  %v1454_v2 = vmul.f32 %v3433_v33, %v1407_v47  ;;  %v1455_v46 = vmul.f32 %v3436_v0, %v1411_v56  ;;  %v1667_v42 = vld [vmem:[#allocation8 + $0x78] sm:$0xff]  ;;  %v1664_v33 = vld [vmem:[#allocation8 + $0x60] sm:$0xff]  ;;  %v2412_v40 = vpop.f32.mrf.mxu1 }
 0x3fb   : > { %v1459_v48 = vmul.f32 %v3425_v15, %v1427_v49  ;;  %2422 = vmatprep.subr.mxu0 %v1667_v42  ;;  %v1456_v13 = vmul.f32 %v3439_v37, %v1415_v50  ;;  %v1457_v15 = vmul.f32 %v3442_v14, %v1419_v52  ;;  %v1663_v0 = vld [vmem:[#allocation8 + $0x58] sm:$0xff]  ;;  %v1458_v51 = vmul.f32 %v3445_v35, %v1423_v60  ;;  %v1661_v37 = vld [vmem:[#allocation8 + $0x48] sm:$0xff] }
 0x3fc   : > { %1507 = vperm.xlu1 %2630, %v1453_v54   ;;  %1502 = vperm.xlu0 %2629, %v1452_v44   ;;  %v1659_v14 = vld [vmem:[#allocation8 + $0x38] sm:$0xff]  ;;  %v850_v39 = vadd.f32 %v2403_v30, %v3530_v12  ;;  %v880_v19 = vadd.f32 %v2412_v40, %v3530_v12 }
 0x3fd   : > { %2423 = vmatpush3.msra.mxu0 %v1667_v42  ;;  %v1655_v35 = vld [vmem:[#allocation8 + $0x18] sm:$0xff] }
 0x3fe   : > { %2424 = vmatprep.subr.mxu0 %v1666_v34 }
 0x3ff   : > { %2425 = vmatpush3.msra.mxu0 %v1666_v34 }
 0x400   : > { %1512 = vperm.xlu1 %2630, %v1454_v2   ;;  %1497 = vperm.xlu0 %2629, %v1451_v8   ;;  %v855_v2 = vadd.f32 %v3530_v12, %v854_v11  ;;  %v874_v8 = vpop.f32.mrf.mxu1 }
 0x401   : > { %2426 = vmatprep.subr.mxu0 %v1665_v4  ;;  %v875_v21 = vadd.f32 %v3530_v12, %v874_v8 }
 0x402   : > { %2427 = vmatpush3.msra.mxu0 %v1665_v4  ;;  %v2415_v52 = vpop.f32.mrf.mxu1 }
 0x403   : > { %2428 = vmatprep.subr.mxu0 %v1664_v33  ;;  %v890_v8 = vadd.f32 %v2415_v52, %v3530_v12 }
 0x404   : > { %1517 = vperm.xlu1 %2630, %v1455_v46   ;;  %1537 = vperm.xlu0 %2629, %v1459_v48   ;;  %v860_v46 = vadd.f32 %v2406_v31, %v3530_v12 }
 0x405   : > { %2429 = vmatpush3.msra.mxu0 %v1664_v33 }
 0x406   : > { %2430 = vmatprep.subr.mxu0 %v1663_v0 }
 0x407   : > { %2431 = vmatpush3.msra.mxu0 %v1663_v0 }
 0x408   : > { %1522 = vperm.xlu1 %2630, %v1456_v13   ;;  %2432 = vmatprep.subr.mxu0 %v1662_v63  ;;  %v865_v13 = vadd.f32 %v3530_v12, %v864_v57 }
 0x409   : > { %2433 = vmatpush3.msra.mxu0 %v1662_v63 }
 0x40a   : > { %2434 = vmatprep.subr.mxu0 %v1661_v37 }
 0x40b   : > { %2435 = vmatpush3.msra.mxu0 %v1661_v37 }
 0x40c   : > { %1527 = vperm.xlu1 %2630, %v1457_v15   ;;  %2436 = vmatprep.subr.mxu0 %v1660_v58 }
 0x40d   : > { %2437 = vmatpush3.msra.mxu0 %v1660_v58  ;;  %v884_v58 = vpop.f32.mrf.mxu1 }
 0x40e   : > { %2438 = vmatprep.subr.mxu0 %v1659_v14  ;;  %v885_v32 = vadd.f32 %v3530_v12, %v884_v58 }
 0x40f   : > { %2439 = vmatpush3.msra.mxu0 %v1659_v14  ;;  %v3541_v3 = vpop.f32.mrf.mxu1 }
 0x410   : > { %1532 = vperm.xlu1 %2630, %v1458_v51   ;;  %2440 = vmatprep.subr.mxu0 %v1658_v55 }
 0x411   : > { %2441 = vmatpush3.msra.mxu0 %v1658_v55  ;;  %v894_v23 = vpop.f32.mrf.mxu1 }
 0x412   : > { %2442 = vmatprep.subr.mxu0 %v1657_v59 }
 0x413   : > { %2443 = vmatpush3.msra.mxu0 %v1657_v59 }
 0x414   : > { %2444 = vmatprep.subr.mxu0 %v1656_v10 }
 0x415   : > { %2445 = vmatpush3.msra.mxu0 %v1656_v10 }
 0x416   : > { %2446 = vmatprep.subr.mxu0 %v1655_v35 }
 0x417   : > { %2447 = vmatpush3.msra.mxu0 %v1655_v35 }
 0x418   : > { %2448 = vmatprep.subr.mxu0 %v1654_v62 }
 0x419   : > { %2449 = vmatpush3.msra.mxu0 %v1654_v62 }
 0x41a   : > { %2450 = vmatprep.subr.mxu0 %v1653_v5 }
 0x41b   : > { %2451 = vmatpush3.msra.mxu0 %v1653_v5 }
 0x41c   : > { %2452 = vmatprep.subr.mxu0 %v1652_v9 }
 0x41d   : > { %2453 = vmatpush3.msra.mxu0 %v1652_v9 }
 0x45d   : > { %v1468_v36 = vpop.permute.xlu1 %1467  ;;  %v1463_v38 = vpop.permute.xlu0 %1462 }
 0x45e   : > { %v1541_v54 = vmul.f32 %v1468_v36, %v840_v61  ;;  %v1540_v44 = vmul.f32 %v1463_v38, %v835_v7  ;;  %v870_v61 = vadd.f32 %v3532_v41, %v3530_v12  ;;  %v2421_v7 = vpop.f32.mrf.mxu1 }
 0x460   : > { %v1562_v56 = vrot.slane %v1541_v54, 4  ;;  %v1556_v49 = vrot.slane %v1540_v44, 4 }
 0x461   : > { %v1478_v53 = vpop.permute.xlu0 %1477  ;;  %v1473_v43 = vpop.permute.xlu1 %1472 }
 0x462   : > { %v1542_v47 = vmul.f32 %v1473_v43, %v845_v16  ;;  %v1543_v48 = vmul.f32 %v1478_v53, %v850_v39  ;;  %v1563_v4 = vadd.f32 %v1562_v56, %v1541_v54  ;;  %v1557_v33 = vadd.f32 %v1556_v49, %v1540_v44 }
 0x463   : > { %v910_v49 = vadd.f32 %v2421_v7, %v3530_v12 }
 0x464   : > { %v1568_v50 = vrot.slane %v1542_v47, 4  ;;  %v1574_v15 = vrot.slane %v1543_v48, 4  ;;  %v1564_v14 = vrot.slane %v1563_v4, 2  ;;  %v1558_v55 = vrot.slane %v1557_v33, 2 }
 0x465   : > { %v1483_v45 = vpop.permute.xlu0 %1482 }
 0x466   : > { %v1544_v34 = vmul.f32 %v1483_v45, %v855_v2  ;;  %v1569_v0 = vadd.f32 %v1568_v50, %v1542_v47  ;;  %v1575_v59 = vadd.f32 %v1574_v15, %v1543_v48  ;;  %v1565_v5 = vadd.f32 %v1564_v14, %v1563_v4 }
 0x467   : > { %v1559_v6 = vadd.f32 %v1558_v55, %v1557_v33 }
 0x468   : > { %v1580_v51 = vrot.slane %v1544_v34, 4  ;;  %v1570_v62 = vrot.slane %v1569_v0, 2  ;;  %v1576_v9 = vrot.slane %v1575_v59, 2  ;;  %v1566_v24 = vrot.slane %v1565_v5, 1 }
 0x469   : > { %v1488_v42 = vpop.permute.xlu0 %1487  ;;  %v1560_v25 = vrot.slane %v1559_v6, 1 }
 0x46a   : > { %v1545_v60 = vmul.f32 %v1488_v42, %v860_v46  ;;  %v1581_v1 = vadd.f32 %v1580_v51, %v1544_v34  ;;  %v1571_v20 = vadd.f32 %v1570_v62, %v1569_v0  ;;  %v1577_v26 = vadd.f32 %v1576_v9, %v1575_v59 }
 0x46b   : > { %v1567_v57 = vadd.f32 %v1566_v24, %v1565_v5  ;;  %v1561_v16 = vadd.f32 %v1560_v25, %v1559_v6  ;;  %v895_v34 = vadd.f32 %v3530_v12, %v894_v23 }
 0x46c   : > { %v1586_v10 = vrot.slane %v1545_v60, 4  ;;  %v1582_v22 = vrot.slane %v1581_v1, 2  ;;  %v1572_v11 = vrot.slane %v1571_v20, 1  ;;  %v1578_v53 = vrot.slane %v1577_v26, 1 }
 0x46d   : > { %v1493_v63 = vpop.permute.xlu0 %1492  ;;  %v1691_v50 = vsel %vm1050_vm0, %v1567_v57, %v1561_v16 }
 0x46e   : > { %v1546_v37 = vmul.f32 %v1493_v63, %v865_v13  ;;  %v1587_v17 = vadd.f32 %v1586_v10, %v1545_v60  ;;  %v1583_v38 = vadd.f32 %v1582_v22, %v1581_v1  ;;  %v1573_v2 = vadd.f32 %v1572_v11, %v1571_v20 }
 0x46f   : > { %v1579_v33 = vadd.f32 %v1578_v53, %v1577_v26  ;;  %v900_v20 = vadd.f32 %v3541_v3, %v3530_v12  ;;  %v904_v26 = vpop.f32.mrf.mxu1 }
 0x470   : > { %v1592_v35 = vrot.slane %v1546_v37, 4  ;;  %v1588_v27 = vrot.slane %v1587_v17, 2  ;;  %v1584_v46 = vrot.slane %v1583_v38, 1  ;;  %v1692_v63 = vsel %vm1052_vm1, %v1573_v2, %v1691_v50 }
 0x471   : > { %v1693_v6 = vsel %vm1054_vm2, %v1579_v33, %v1692_v63  ;;  %v905_v3 = vadd.f32 %v3530_v12, %v904_v26  ;;  %v1886_v26 = vld [vmem:[#allocation11 + $0x20] sm:$0xff] }
 0x472   : > { %v1593_v18 = vadd.f32 %v1592_v35, %v1546_v37  ;;  %v1589_v43 = vadd.f32 %v1588_v27, %v1587_v17  ;;  %v1585_v58 = vadd.f32 %v1584_v46, %v1583_v38 }
 0x474   : > { %v1594_v30 = vrot.slane %v1593_v18, 2  ;;  %v1590_v42 = vrot.slane %v1589_v43, 1  ;;  %v1694_v23 = vsel %vm1056_vm3, %v1585_v58, %v1693_v6  ;;  %v1897_v6 = vld [vmem:[#allocation11 + $0x78] sm:$0xff] }
 0x475   : > { %2492 = vmatprep.subr.mxu0 %v1897_v6 }
 0x476   : > { %v1595_v54 = vadd.f32 %v1594_v30, %v1593_v18  ;;  %v1591_v59 = vadd.f32 %v1590_v42, %v1589_v43 }
 0x477   : > { %v1508_v28 = vpop.permute.xlu1 %1507  ;;  %v1503_v29 = vpop.permute.xlu0 %1502 }
 0x478   : > { %v1549_v31 = vmul.f32 %v1508_v28, %v880_v19  ;;  %v1548_v36 = vmul.f32 %v1503_v29, %v875_v21  ;;  %v1596_v15 = vrot.slane %v1595_v54, 1  ;;  %v1695_v28 = vsel %vm1058_vm4, %v1591_v59, %v1694_v23  ;;  %v1889_v23 = vld [vmem:[#allocation11 + $0x38] sm:$0xff] }
 0x47a   : > { %v1610_v44 = vrot.slane %v1549_v31, 4  ;;  %v1604_v56 = vrot.slane %v1548_v36, 4  ;;  %v1597_v62 = vadd.f32 %v1596_v15, %v1595_v54 }
 0x47b   : > { %v1513_v40 = vpop.permute.xlu1 %1512  ;;  %v1498_v39 = vpop.permute.xlu0 %1497 }
 0x47c   : > { %v1550_v47 = vmul.f32 %v1513_v40, %v885_v32  ;;  %v1547_v45 = vmul.f32 %v1498_v39, %v870_v61  ;;  %v1611_v60 = vadd.f32 %v1610_v44, %v1549_v31  ;;  %v1605_v52 = vadd.f32 %v1604_v56, %v1548_v36 }
 0x47d   : > { %v1696_v32 = vsel %vm1060_vm5, %v1597_v62, %v1695_v28  ;;  %v2180_v28 = vld [vmem:[%s3640_s7] ss:$0 sm:$0xff] }
 0x47e   : > { %v1616_v48 = vrot.slane %v1550_v47, 4  ;;  %v1598_v41 = vrot.slane %v1547_v45, 4  ;;  %v1612_v1 = vrot.slane %v1611_v60, 2  ;;  %v1606_v9 = vrot.slane %v1605_v52, 2 }
 0x47f   : > { %v1518_v13 = vpop.permute.xlu1 %1517  ;;  %v1538_v4 = vpop.permute.xlu0 %1537 }
 0x480   : > { %v1599_v0 = vadd.f32 %v1598_v41, %v1547_v45  ;;  %v1551_v51 = vmul.f32 %v1518_v13, %v890_v8  ;;  %v1555_v37 = vmul.f32 %v1538_v4, %v910_v49  ;;  %v1617_v14 = vadd.f32 %v1616_v48, %v1550_v47 }
 0x481   : > { %v1613_v31 = vadd.f32 %v1612_v1, %v1611_v60  ;;  %v1607_v11 = vadd.f32 %v1606_v9, %v1605_v52  ;;  %v1783_v1 = vld [vmem:[#allocation10 + $0x8] sm:$0xff]  ;;  %v1896_v9 = vld [vmem:[#allocation11 + $0x70] sm:$0xff] }
 0x482   : > { %v1600_v55 = vrot.slane %v1599_v0, 2  ;;  %v1622_v10 = vrot.slane %v1551_v51, 4  ;;  %v1646_v18 = vrot.slane %v1555_v37, 4  ;;  %v1618_v21 = vrot.slane %v1617_v14, 2  ;;  %2485 = vmatprep.subr.mxu1 %v1783_v1 }
 0x483   : > { %v1523_v35 = vpop.permute.xlu1 %1522  ;;  %v1614_v54 = vrot.slane %v1613_v31, 1  ;;  %v1608_v44 = vrot.slane %v1607_v11, 1  ;;  %2486 = vmatpush3.msra.mxu1 %v1783_v1 }
 0x484   : > { %v1601_v5 = vadd.f32 %v1600_v55, %v1599_v0  ;;  %v1623_v17 = vadd.f32 %v1622_v10, %v1551_v51  ;;  %v1552_v19 = vmul.f32 %v1523_v35, %v895_v34  ;;  %v1647_v36 = vadd.f32 %v1646_v18, %v1555_v37  ;;  %v1894_v18 = vld [vmem:[#allocation11 + $0x60] sm:$0xff] }
 0x485   : > { %v1619_v61 = vadd.f32 %v1618_v21, %v1617_v14  ;;  %v1615_v41 = vadd.f32 %v1614_v54, %v1613_v31  ;;  %v1609_v50 = vadd.f32 %v1608_v44, %v1607_v11  ;;  %v1891_v21 = vld [vmem:[#allocation11 + $0x48] sm:$0xff]  ;;  %v1885_v31 = vld [vmem:[#allocation11 + $0x18] sm:$0xff]  ;;  %v1884_v11 = vld [vmem:[#allocation11 + $0x10] sm:$0xff] }
 0x486   : > { %v1602_v22 = vrot.slane %v1601_v5, 1  ;;  %v1624_v24 = vrot.slane %v1623_v17, 2  ;;  %v1628_v25 = vrot.slane %v1552_v19, 4  ;;  %v1648_v47 = vrot.slane %v1647_v36, 2 }
 0x487   : > { %v1528_v27 = vpop.permute.xlu1 %1527  ;;  %v1620_v2 = vrot.slane %v1619_v61, 1  ;;  %v1698_v0 = vsel %vm1050_vm0, %v1615_v41, %v1609_v50 }
 0x488   : > { %v1553_v29 = vmul.f32 %v1528_v27, %v900_v20  ;;  %v1603_v30 = vadd.f32 %v1602_v22, %v1601_v5  ;;  %v1629_v38 = vadd.f32 %v1628_v25, %v1552_v19  ;;  %v1625_v16 = vadd.f32 %v1624_v24, %v1623_v17  ;;  %v1782_v5 = vld [vmem:[#allocation10] sm:$0xff]  ;;  %v1895_v17 = vld [vmem:[#allocation11 + $0x68] sm:$0xff]  ;;  %v1893_v19 = vld [vmem:[#allocation11 + $0x58] sm:$0xff] }
 0x489   : > { %v1649_v42 = vadd.f32 %v1648_v47, %v1647_v36  ;;  %v1621_v34 = vadd.f32 %v1620_v2, %v1619_v61  ;;  %2487 = vmatprep.subr.mxu1 %v1782_v5  ;;  %v1892_v20 = vld [vmem:[#allocation11 + $0x50] sm:$0xff]  ;;  %v1890_v22 = vld [vmem:[#allocation11 + $0x40] sm:$0xff]  ;;  %v1887_v25 = vld [vmem:[#allocation11 + $0x28] sm:$0xff] }
 0x48a   : > { %v1634_v7 = vrot.slane %v1553_v29, 4  ;;  %v1697_v57 = vsel %vm1062_vm6, %v1603_v30, %v1696_v32  ;;  %v1630_v53 = vrot.slane %v1629_v38, 2  ;;  %v1626_v49 = vrot.slane %v1625_v16, 1  ;;  %2488 = vmatpush3.msra.mxu1 %v1782_v5  ;;  %v1888_v24 = vld [vmem:[#allocation11 + $0x30] sm:$0xff]  ;;  %v1883_v36 = vld [vmem:[#allocation11 + $0x8] sm:$0xff] }
 0x48b   : > { %v1533_v43 = vpop.permute.xlu1 %1532  ;;  %2454 = vmatprep.mubr.f32.mxu0 %v1697_v57  ;;  %v1650_v63 = vrot.slane %v1649_v42, 1  ;;  %v1699_v51 = vsel %vm1052_vm1, %v1621_v34, %v1698_v0  ;;  %v2181_v61 = vld [vmem:[%s3642_s9] ss:$0 sm:$0xff] }
 0x48c   : > { %v1635_v40 = vadd.f32 %v1634_v7, %v1553_v29  ;;  %v1554_v39 = vmul.f32 %v1533_v43, %v905_v3  ;;  %v1631_v45 = vadd.f32 %v1630_v53, %v1629_v38  ;;  %v1627_v33 = vadd.f32 %v1626_v49, %v1625_v16  ;;  %v1882_v38 = vld [vmem:[#allocation11] sm:$0xff] }
 0x48d   : > { %v1651_v59 = vadd.f32 %v1650_v63, %v1649_v42  ;;  %v2184_v63 = vld [vmem:[%s3646_s13] ss:$0 sm:$0xff] }
 0x48e   : > { %v1636_v8 = vrot.slane %v1635_v40, 2  ;;  %v1640_v56 = vrot.slane %v1554_v39, 4  ;;  %v1632_v46 = vrot.slane %v1631_v45, 1  ;;  %v1700_v58 = vsel %vm1054_vm2, %v1627_v33, %v1699_v51 }
 0x490   : > { %v1637_v48 = vadd.f32 %v1636_v8, %v1635_v40  ;;  %v1641_v12 = vadd.f32 %v1640_v56, %v1554_v39  ;;  %v1633_v15 = vadd.f32 %v1632_v46, %v1631_v45  ;;  %v2182_v40 = vld [vmem:[%s3644_s11] ss:$0 sm:$0xff] }
 0x492   : > { %v1638_v13 = vrot.slane %v1637_v48, 1  ;;  %v1642_v4 = vrot.slane %v1641_v12, 2  ;;  %v1701_v14 = vsel %vm1056_vm3, %v1633_v15, %v1700_v58  ;;  %v2183_v15 = vld [vmem:[%s3645_s12] ss:$0 sm:$0xff] }
 0x494   : > { %v1643_v60 = vadd.f32 %v1642_v4, %v1641_v12  ;;  %v1639_v52 = vadd.f32 %v1638_v13, %v1637_v48 }
 0x496   : > { %v1644_v37 = vrot.slane %v1643_v60, 1  ;;  %v1702_v10 = vsel %vm1058_vm4, %v1639_v52, %v1701_v14 }
 0x498   : > { %v1645_v55 = vadd.f32 %v1644_v37, %v1643_v60 }
 0x49a   : > { %v1703_v35 = vsel %vm1060_vm5, %v1645_v55, %v1702_v10 }
 0x49b   : > { %v1704_v62 = vsel %vm1062_vm6, %v1651_v59, %v1703_v35 }
 0x49c   : > { %2455 = vmatmul.mubr.f32.vlgmr.msra.gmra.mxu0 %v1704_v62 }
 0x49d   : > { %2493 = vmatpush3.msra.mxu0 %v1897_v6 }
 0x49e   : > { %2494 = vmatprep.subr.mxu0 %v1896_v9 }
 0x49f   : > { %2495 = vmatpush3.msra.mxu0 %v1896_v9 }
 0x4a0   : > { %2496 = vmatprep.subr.mxu0 %v1895_v17 }
 0x4a1   : > { %2497 = vmatpush3.msra.mxu0 %v1895_v17 }
 0x4a2   : > { %2498 = vmatprep.subr.mxu0 %v1894_v18 }
 0x4a3   : > { %2499 = vmatpush3.msra.mxu0 %v1894_v18 }
 0x4a4   : > { %2500 = vmatprep.subr.mxu0 %v1893_v19 }
 0x4a5   : > { %2501 = vmatpush3.msra.mxu0 %v1893_v19 }
 0x4a6   : > { %2502 = vmatprep.subr.mxu0 %v1892_v20 }
 0x4a7   : > { %2503 = vmatpush3.msra.mxu0 %v1892_v20 }
 0x4a8   : > { %2504 = vmatprep.subr.mxu0 %v1891_v21 }
 0x4a9   : > { %2505 = vmatpush3.msra.mxu0 %v1891_v21 }
 0x4aa   : > { %2506 = vmatprep.subr.mxu0 %v1890_v22 }
 0x4ab   : > { %2507 = vmatpush3.msra.mxu0 %v1890_v22 }
 0x4ac   : > { %2508 = vmatprep.subr.mxu0 %v1889_v23 }
 0x4ad   : > { %2509 = vmatpush3.msra.mxu0 %v1889_v23 }
 0x4ae   : > { %2510 = vmatprep.subr.mxu0 %v1888_v24 }
 0x4af   : > { %2511 = vmatpush3.msra.mxu0 %v1888_v24 }
 0x4b0   : > { %2512 = vmatprep.subr.mxu0 %v1887_v25 }
 0x4b1   : > { %2513 = vmatpush3.msra.mxu0 %v1887_v25 }
 0x4b2   : > { %2514 = vmatprep.subr.mxu0 %v1886_v26 }
 0x4b3   : > { %2515 = vmatpush3.msra.mxu0 %v1886_v26 }
 0x4b4   : > { %2516 = vmatprep.subr.mxu0 %v1885_v31 }
 0x4b5   : > { %2517 = vmatpush3.msra.mxu0 %v1885_v31 }
 0x4b6   : > { %2518 = vmatprep.subr.mxu0 %v1884_v11 }
 0x4b7   : > { %2519 = vmatpush3.msra.mxu0 %v1884_v11 }
 0x4b8   : > { %2520 = vmatprep.subr.mxu0 %v1883_v36 }
 0x4b9   : > { %2521 = vmatpush3.msra.mxu0 %v1883_v36 }
 0x4ba   : > { %2522 = vmatprep.subr.mxu0 %v1882_v38 }
 0x4bb   : > { %2523 = vmatpush3.msra.mxu0 %v1882_v38 }
 0x55c   : > { %v2456_v27 = vpop.f32.mrf.mxu0 }
 0x55d   : > { %v1779_v32 = vadd.f32 %v2456_v27, %v2180_v28 }
 0x55e   : > { %v1773_v29 = vpop.f32.mrf.mxu0 }
 0x55f   : > { %v1774_v30 = vadd.f32 %v2180_v28, %v1773_v29 }
 0x561   : > { %2489 = vmatprep.mubr.f32.mxu1 %v1774_v30 }
 0x562   : > { %2490 = vmatmul.mubr.f32.vlgmr.msra.gmra.mxu1 %v1779_v32 }
 0x622   : > { %v2491_v3 = vpop.f32.mrf.mxu1 }
 0x623   : > { %v1877_v7 = vadd.f32 %v2491_v3, %v2181_v61 }
 0x624   : > { %v1871_v57 = vpop.f32.mrf.mxu1 }
 0x625   : > { %v1872_v16 = vadd.f32 %v2181_v61, %v1871_v57  ;;  %v1881_v43 = vmax.f32 %v1877_v7, 0.0 }
 0x627   : > { %v1880_v53 = vmax.f32 %v1872_v16, 0.0 }
 0x629   : > { %2524 = vmatprep.mubr.f32.mxu0 %v1880_v53 }
 0x62a   : > { %2525 = vmatmul.mubr.f32.vlgmr.msra.gmra.mxu0 %v1881_v43 }
 0x6ea   : > { %v2526_v39 = vpop.f32.mrf.mxu0 }
 0x6eb   : > { %v1977_v54 = vadd.f32 %v2526_v39, %v2182_v40 }
 0x6ec   : > { %v1971_v44 = vpop.f32.mrf.mxu0 }
 0x6ed   : > { %v1972_v47 = vadd.f32 %v2182_v40, %v1971_v44  ;;  %1982 = vadd.xlane.f32.xlu0 %v1977_v54 }
 0x6ef   : > { %1980 = vadd.xlane.f32.xlu1 %v1972_v47 }
 0x776   : > { %v1983_v45 = vpop.xlane.xlu0 %1982 }
 0x777   : > { %v1986_v2 = vmul.f32 0.0078125, %v1983_v45 }
 0x778   : > { %v1981_v8 = vpop.xlane.xlu1 %1980 }
 0x779   : > { %v1988_v56 = vsub.f32 %v1977_v54, %v1986_v2  ;;  %v1985_v49 = vmul.f32 0.0078125, %v1981_v8 }
 0x77b   : > { %v1987_v46 = vsub.f32 %v1972_v47, %v1985_v49  ;;  %v1990_v48 = vmul.f32 %v1988_v56, %v1988_v56 }
 0x77d   : > { %1993 = vadd.xlane.f32.xlu1 %v1990_v48  ;;  %v1989_v12 = vmul.f32 %v1987_v46, %v1987_v46 }
 0x77f   : > { %1991 = vadd.xlane.f32.xlu0 %v1989_v12 }
 0x806   : > { %v1994_v41 = vpop.xlane.xlu1 %1993 }
 0x807   : > { %v1996_v50 = vmul.f32 0.0078125, %v1994_v41 }
 0x808   : > { %v1992_v42 = vpop.xlane.xlu0 %1991 }
 0x809   : > { %v1998_v34 = vadd.f32 1e-05, %v1996_v50  ;;  %v1995_v13 = vmul.f32 0.0078125, %v1992_v42 }
 0x80b   : > { %2667 = vrsqrt.f32 %v1998_v34  ;;  %v1997_v4 = vadd.f32 1e-05, %v1995_v13 }
 0x80d   : > { %2669 = vrsqrt.f32 %v1997_v4 }
 0x818   : > { %v2668_v33 = vpop.eup %2667 }
 0x819   : > { %v2002_v60 = vmul.f32 %v2668_v33, %v1988_v56 }
 0x81a   : > { %v2670_v0 = vpop.eup %2669 }
 0x81b   : > { %v2011_v52 = vmul.f32 %v2183_v15, %v2002_v60  ;;  %v2001_v51 = vmul.f32 %v2670_v0, %v1987_v46 }
 0x81d   : > { %v2020_v37 = vadd.f32 %v2184_v63, %v2011_v52  ;;  %v2010_v58 = vmul.f32 %v2183_v15, %v2001_v51 }
 0x81f   : > { %v2019_v14 = vadd.f32 %v2184_v63, %v2010_v58  ;;  %2022 = vst [vmem:[%s558_s14 + $0x8] sm:$0xff] %v2020_v37 }
 0x821   : > { %2021 = vst [vmem:[%s558_s14] sm:$0xff] %v2019_v14 }
 0x822   : > { %2842 = shalt.err (!%p2839_p3)
}
 0x823   : > { %s2843_s6 = scalar_lea.hbm %s3588_s10, 256  ;;  %s2847_s17 = scalar_lea.hbm %s3686_s28, 512 }
 0x824   : > { %p2844_p4 = scmp.ne.s32.totalorder %s3588_s10, %s2843_s6  ;;  %p2848_p2 = scmp.lt.s32.totalorder %s3588_s10, %s3686_s28 }
 0x825   : > { %p2849_p7 = scmp.lt.s32.totalorder %s2847_s17, %s2843_s6 }
 0x826   : > { %p2845_p12 = pnand %p2844_p4, %p3687_p11 }
 0x827   : > { %p2850_p8 = por %p2849_p7, %p2848_p2 }
 0x828   : > { %p2846_p6 = pneg %p2845_p12 }
 0x82a   : > { %p2851_p10 = pnand %p2850_p8, %p2846_p6 }
 0x82c   : > { %2854 = shalt.err (!%p2851_p10)
}
 0x82d   : > { %s2917_s24 = smov 128   ;;  %s2918_s15 = smov 8  }
 0x82e   : > { %2549 = dma.vmem_to_hbm [thread:$0]  (%p3687_p11), %s3590_s23, 256, %s3588_s10, %s2024_s27, %s2917_s24, %s2917_s24, %s2918_s15  }
 0x82f PF: > { %s2052_s19 = sand.u32 1, %s2893_s29   ;;  %p3688_p0 = scmp.ne.s32.totalorder %s3674_s22, 0 }
 0x830   : > { %p3689_p13 = scmp.ge.s32.totalorder %s2905_s16, 2  ;;  %s2053_s21 = scalar_lea.sflag [#allocation4], %s2052_s19 }
 0x832   : > { %p2572_p5 = pnand %p3689_p13, %p3688_p0 }
 0x834   : > { %p2573_p9 = pneg %p2572_p5 }
 0x836   : > { %2888 = dma.done.wait (%p2573_p9), %s2053_s21, 256  }
 0x837   : > { %2890 = vsyncadd (%p2573_p9), %s2053_s21, 4294967040  ;;  %s3690_s4 = sld [smem:[#allocation19_spill]]  ;;  %p30_p1 = scmp.ge.s32.totalorder %s3105_s26, 4  }
 0x838   : > { %s3691_s15 = sld [smem:[#allocation20_spill]]  ;;  %s3692_s29 = smov %s2897_s30 }
 0x839   : > { %s3694_s16 = smov %s3105_s26  ;;  %32 = sbr.rel (!%p30_p1) target bundleno = 15 (0xf), region = 141 }
 0x83d   : > { %s3693_s30 = smov %s3690_s4 }
 0x83e   :  { %2058 = vsyncpa [#allocation3], 1 }
 0x83f   :  { %2060 = vsyncpa [#allocation3 + $0x1], 1 }
 0x840   :  { %2061 = vsyncpa [#allocation6], 1 }
 0x841   :  { %2062 = vsyncpa [#allocation9], 1 }
 0x842   :  { %2063 = vsyncpa [#allocation12], 1 }
 0x843   :  { %2064 = vsyncpa [#allocation4], 1 }
 0x844   :  { %2066 = vsyncpa [#allocation4 + $0x1], 1 }

</bundles_post_ra>
